<compile_context>
chip_gen: v7x
topology: tpu7x:2x2x1
jax: 0.10.0
libtpu: 0.0.40
codegen_flags: <defaults>
</compile_context>

<pallas_src>
import functools

import jax
import jax.numpy as jnp
from jax.experimental import pallas as pl
from jax.experimental.pallas import tpu as pltpu

C_PAD = 8  # every channel axis is zero-padded to 8 (= one sublane tile)


# ----------------------------------------------------------------------------
# Fused forward kernel (one batch element per grid step)
# ----------------------------------------------------------------------------
def _tap_patch(x, mask_ref, shifts, hw):
    """(9*C_PAD, hw) im2col patch for a 3x3 conv, built with lane rolls.

    x:        (C_PAD, hw) feature map, spatial flattened onto lanes.
    mask_ref: (9, 1, hw) 0/1 validity masks (zero padding + grid embedding).
    shifts:   9 static lane-roll amounts (one per tap).
    """
    taps = []
    for k in range(9):
        t = x if shifts[k] == 0 else pltpu.roll(x, shifts[k], axis=1)
        taps.append(t * mask_ref[k])                       # mask == in-kernel zero pad
    return jnp.stack(taps, axis=0).reshape(9 * C_PAD, hw)  # (72, hw)


def _conv3x3(x, w_ref, b_ref, mask_ref, shifts, hw, relu=True):
    """3x3 conv as a single MXU matmul: (8, 72) @ (72, hw)."""
    y = jnp.dot(w_ref[...], _tap_patch(x, mask_ref, shifts, hw),
                preferred_element_type=jnp.float32) + b_ref[...]
    return jnp.maximum(y, 0.0) if relu else y


def _pool2x2(x, step, w0, hw):
    """2x2 / stride-2 max pool of the grid embedded at stride `step`.

    Result values are valid at positions whose row/col are multiples of 2*step.
    """
    x = jnp.maximum(x, pltpu.roll(x, (-step) % hw, axis=1))        # + step cols
    x = jnp.maximum(x, pltpu.roll(x, (-step * w0) % hw, axis=1))   # + step rows
    return x


def _hrnet_kernel(x_ref, m1_ref, m2_ref, up_ref, cc_ref,
                  w1_ref, b1_ref, w2_ref, b2_ref, w3_ref, b3_ref,
                  w5x_ref, w5u_ref, w5c_ref, b5_ref,
                  w6_ref, b6_ref, w7_ref, b7_ref,
                  o_ref, *, w0, hw, sh1, sh2):
    x = x_ref[0]                                                     # (8, hw)

    # ---- stand-in HighResolutionNet backbone: 3 -> 2 ch at 1/4 resolution ----
    h = _conv3x3(x, w1_ref, b1_ref, m1_ref, sh1, hw)                 # 3 -> 8, relu
    h = _pool2x2(h, 1, w0, hw)                                       # valid @ stride 2
    h = _conv3x3(h, w2_ref, b2_ref, m2_ref, sh2, hw)                 # 8 -> 8 on the 1/2-res grid
    h = _pool2x2(h, 2, w0, hw)                                       # valid @ stride 4
    z = jnp.dot(w3_ref[...], h,
                preferred_element_type=jnp.float32) + b3_ref[...]    # 1x1, 8 -> 2

    # ---- F.interpolate(x1, scale_factor=4) (nearest): one constant matmul ----
    x1 = jnp.dot(z, up_ref[...], preferred_element_type=jnp.float32)  # (8, hw)

    # ---- cat((x, x1), 1) + AddCoords(rank=2) + relu(conv5), as grouped matmuls ----
    cc = cc_ref[...]                                                  # coord channels
    y = (jnp.dot(w5x_ref[...], _tap_patch(x, m1_ref, sh1, hw),
                 preferred_element_type=jnp.float32)
         + jnp.dot(w5u_ref[...], _tap_patch(x1, m1_ref, sh1, hw),
                   preferred_element_type=jnp.float32)
         + jnp.dot(w5c_ref[...], _tap_patch(cc, m1_ref, sh1, hw),
                   preferred_element_type=jnp.float32)
         + b5_ref[...])
    y = jnp.maximum(y, 0.0)                                           # relu(conv5)
    y = _conv3x3(y, w6_ref, b6_ref, m1_ref, sh1, hw)                  # relu(conv6)

    # ---- conv7 (1x1) + MaxPool2d(width) == global spatial max (fused) ----
    y = jnp.dot(w7_ref[...], y, preferred_element_type=jnp.float32) + b7_ref[...]
    o_ref[...] = jnp.max(y, axis=1, keepdims=True)[None]              # (1, 8, 1)


# ----------------------------------------------------------------------------
# Host-side constant / weight preparation
# ----------------------------------------------------------------------------
def _flat3x3(w):
    """(3,3,cin,cout) -> (8, 72): taps (ky,kx) major / cin minor, channels padded."""
    kh, kw, cin, cout = w.shape
    wp = jnp.zeros((kh, kw, C_PAD, C_PAD), jnp.float32).at[:, :, :cin, :cout].set(w)
    return wp.reshape(kh * kw * C_PAD, C_PAD).T


def _flat1x1(w):
    """(cin, cout) -> (8, 8)."""
    cin, cout = w.shape
    wp = jnp.zeros((C_PAD, C_PAD), jnp.float32).at[:cin, :cout].set(w)
    return wp.T


def _pad_bias(b):
    return jnp.zeros((C_PAD, 1), jnp.float32).at[:b.shape[0], 0].set(b)


def _tap_shifts(w0, hw, step):
    """Lane-roll amounts so that rolled[p] == x[p + dy*step*w0 + dx*step]."""
    return tuple(int((-(dy * step * w0 + dx * step)) % hw)
                 for dy in (-1, 0, 1) for dx in (-1, 0, 1))


def _tap_masks(h0, w0, step):
    """(9, 1, h0*w0) 0/1 masks: output slot lies on the stride-`step` grid and the
    tap's neighbour lies inside the (h0/step x w0/step) image (zero padding)."""
    hw = h0 * w0
    p = jnp.arange(hw)
    r, c = p // w0, p % w0
    on = (r % step == 0) & (c % step == 0)
    i, j = r // step, c // step
    h, w = h0 // step, w0 // step
    ms = []
    for dy in (-1, 0, 1):
        for dx in (-1, 0, 1):
            ms.append(on & (i + dy >= 0) & (i + dy < h) & (j + dx >= 0) & (j + dx < w))
    return jnp.stack(ms)[:, None, :].astype(jnp.float32)


def _upsample4_matrix(h0, w0):
    """(hw, hw) 0/1 matrix: (z @ U)[c, q] = z[c, src(q)] where src(q) is the
    stride-4 grid slot holding the 1/4-res value -> nearest-upsample x4."""
    hw = h0 * w0
    q = jnp.arange(hw)
    r, c = q // w0, q % w0
    src = (r // 4) * 4 * w0 + (c // 4) * 4
    return (jnp.arange(hw)[:, None] == src[None, :]).astype(jnp.float32)


def _coord_channels(h0, w0):
    """AddCoords(rank=2): xx (varies along W) and yy (varies along H) in [-1, 1]."""
    hw = h0 * w0
    q = jnp.arange(hw)
    r, c = q // w0, q % w0
    xx = jnp.linspace(-1.0, 1.0, w0)[c]
    yy = jnp.linspace(-1.0, 1.0, h0)[r]
    return jnp.zeros((C_PAD, hw), jnp.float32).at[0].set(xx).at[1].set(yy)


# ----------------------------------------------------------------------------
# Forward wrapper (single pallas_call)
# ----------------------------------------------------------------------------
@jax.jit
def hrnet_forward(x_nchw, p):
    """x_nchw: (B, 3, H, W) float32 (PyTorch NCHW convention) -> (B, 4)."""
    B, C, H, W = x_nchw.shape
    assert C == 3 and H % 4 == 0 and W % 4 == 0 and (H * W) % 128 == 0
    hw = H * W

    # Input: flatten spatial onto lanes, zero-pad channels to 8 sublanes.
    x = jnp.zeros((B, C_PAD, hw), jnp.float32).at[:, :3, :].set(x_nchw.reshape(B, 3, hw))

    # Constant tables (~0.27 MiB total at 16x16; constant-folded under jit).
    m1 = _tap_masks(H, W, 1)            # full-res 3x3 conv masks
    m2 = _tap_masks(H, W, 2)            # 1/2-res conv masks (grid embedded @ stride 2)
    up = _upsample4_matrix(H, W)        # select 1/4-res value + nearest-upsample x4
    cc = _coord_channels(H, W)          # AddCoords(rank=2) channels
    sh1 = _tap_shifts(W, hw, 1)
    sh2 = _tap_shifts(W, hw, 2)

    # Weights flattened so each 3x3 conv is one K = 9*8 matmul.
    w5 = p["w5"]
    args = (
        x, m1, m2, up, cc,
        _flat3x3(p["hr_w1"]), _pad_bias(p["hr_b1"]),
        _flat3x3(p["hr_w2"]), _pad_bias(p["hr_b2"]),
        _flat1x1(p["hr_w3"]), _pad_bias(p["hr_b3"]),
        _flat3x3(w5[:, :, 0:3, :]),     # conv5, input group: x      (3 ch)
        _flat3x3(w5[:, :, 3:5, :]),     # conv5, input group: x1     (2 ch)
        _flat3x3(w5[:, :, 5:7, :]),     # conv5, input group: coords (2 ch)
        _pad_bias(p["b5"]),
        _flat3x3(p["w6"]), _pad_bias(p["b6"]),
        _flat1x1(p["w7"]), _pad_bias(p["b7"]),
    )

    full2 = lambda i: (0, 0)
    full3 = lambda i: (0, 0, 0)
    in_specs = [
        pl.BlockSpec((1, C_PAD, hw), lambda i: (i, 0, 0)),   # x (per-batch block)
        pl.BlockSpec((9, 1, hw), full3),                     # m1
        pl.BlockSpec((9, 1, hw), full3),                     # m2
        pl.BlockSpec((hw, hw), full2),                       # upsample matrix
        pl.BlockSpec((C_PAD, hw), full2),                    # coord channels
    ]
    in_specs += [pl.BlockSpec(a.shape, full2) for a in args[5:]]

    out = pl.pallas_call(
        functools.partial(_hrnet_kernel, w0=W, hw=hw, sh1=sh1, sh2=sh2),
        out_shape=jax.ShapeDtypeStruct((B, C_PAD, 1), jnp.float32),
        grid=(B,),
        in_specs=in_specs,
        out_specs=pl.BlockSpec((1, C_PAD, 1), lambda i: (i, 0, 0)),
        compiler_params=pltpu.CompilerParams(
            dimension_semantics=("parallel",),   # shard batch across TensorCores
            vmem_limit_bytes=32 * 1024 * 1024,
        ),
    )(*args)
    return out.reshape(B, C_PAD)[:, :4]          # x.view(-1, 4)


# ----------------------------------------------------------------------------
# Pure-JAX (XLA) reference, used to validate the fused kernel
# ----------------------------------------------------------------------------
def _ref_conv(x, w_hwio, b, padding):
    y = jax.lax.conv_general_dilated(
        x, w_hwio, window_strides=(1, 1), padding=padding,
        dimension_numbers=("NCHW", "HWIO", "NCHW"),
        precision=jax.lax.Precision.HIGHEST)
    return y + b.reshape(1, -1, 1, 1)


def _ref_pool2(x):
    return jax.lax.reduce_window(x, -jnp.inf, jax.lax.max,
                                 (1, 1, 2, 2), (1, 1, 2, 2), "VALID")


def hrnet_forward_ref(x, p):
    relu = jax.nn.relu
    h = relu(_ref_conv(x, p["hr_w1"], p["hr_b1"], "SAME"))
    h = _ref_pool2(h)
    h = relu(_ref_conv(h, p["hr_w2"], p["hr_b2"], "SAME"))
    h = _ref_pool2(h)
    h = _ref_conv(h, p["hr_w3"][None, None], p["hr_b3"], "VALID")
    x1 = jnp.repeat(jnp.repeat(h, 4, axis=2), 4, axis=3)          # nearest x4
    B, _, H, W = x.shape
    xx = jnp.broadcast_to(jnp.linspace(-1., 1., W).reshape(1, 1, 1, W), (B, 1, H, W))
    yy = jnp.broadcast_to(jnp.linspace(-1., 1., H).reshape(1, 1, H, 1), (B, 1, H, W))
    y = jnp.concatenate([x, x1, xx, yy], axis=1)                  # (B, 7, H, W)
    y = relu(_ref_conv(y, p["w5"], p["b5"], "SAME"))
    y = relu(_ref_conv(y, p["w6"], p["b6"], "SAME"))
    y = _ref_conv(y, p["w7"][None, None], p["b7"], "VALID")
    return jnp.max(y, axis=(2, 3))                                # MaxPool2d(width) + view


# ----------------------------------------------------------------------------
# Deterministic parameter construction
# ----------------------------------------------------------------------------
def make_params(key):
    def conv_w(key, kh, kw, cin, cout):
        scale = 1.0 / jnp.sqrt(kh * kw * cin)
        return jax.random.uniform(key, (kh, kw, cin, cout), jnp.float32, -scale, scale)

    keys = jax.random.split(key, 12)
    return {
        "hr_w1": conv_w(keys[0], 3, 3, 3, 8),
        "hr_b1": jax.random.uniform(keys[1], (8,), jnp.float32, -0.1, 0.1),
        "hr_w2": conv_w(keys[2], 3, 3, 8, 8),
        "hr_b2": jax.random.uniform(keys[3], (8,), jnp.float32, -0.1, 0.1),
        "hr_w3": conv_w(keys[4], 1, 1, 8, 2).reshape(8, 2),
        "hr_b3": jax.random.uniform(keys[5], (2,), jnp.float32, -0.1, 0.1),
        "w5": conv_w(keys[6], 3, 3, 7, 7),
        "b5": jax.random.uniform(keys[7], (7,), jnp.float32, -0.1, 0.1),
        "w6": conv_w(keys[8], 3, 3, 7, 7),
        "b6": jax.random.uniform(keys[9], (7,), jnp.float32, -0.1, 0.1),
        "w7": conv_w(keys[10], 1, 1, 7, 4).reshape(7, 4),
        "b7": jax.random.uniform(keys[11], (4,), jnp.float32, -0.1, 0.1),
    }


if __name__ == "__main__":
    key = jax.random.PRNGKey(0)
    k_x, k_p = jax.random.split(key)

    B, C, H, W = 2, 3, 16, 16          # width (pool size) == spatial size == 16
    x = jax.random.normal(k_x, (B, C, H, W), jnp.float32)
    params = make_params(k_p)

    out = jax.block_until_ready(hrnet_forward(x, params))
    assert out.shape == (B, 4), out.shape

    ref = jax.block_until_ready(hrnet_forward_ref(x, params))
    assert jnp.allclose(out, ref, rtol=5e-3, atol=5e-3), float(jnp.max(jnp.abs(out - ref)))

    print("KERNEL_OK")
</pallas_src>

<mosaic_0001>
module attributes {stable_mosaic.version = 11 : i64} {
  func.func @_hrnet_kernel(%arg0: i32, %arg1: memref<1x8x256xf32, #tpu.memory_space<vmem>>, %arg2: memref<9x1x256xf32, #tpu.memory_space<vmem>>, %arg3: memref<9x1x256xf32, #tpu.memory_space<vmem>>, %arg4: memref<256x256xf32, #tpu.memory_space<vmem>>, %arg5: memref<8x256xf32, #tpu.memory_space<vmem>>, %arg6: memref<8x72xf32, #tpu.memory_space<vmem>>, %arg7: memref<8x1xf32, #tpu.memory_space<vmem>>, %arg8: memref<8x72xf32, #tpu.memory_space<vmem>>, %arg9: memref<8x1xf32, #tpu.memory_space<vmem>>, %arg10: memref<8x8xf32, #tpu.memory_space<vmem>>, %arg11: memref<8x1xf32, #tpu.memory_space<vmem>>, %arg12: memref<8x72xf32, #tpu.memory_space<vmem>>, %arg13: memref<8x72xf32, #tpu.memory_space<vmem>>, %arg14: memref<8x72xf32, #tpu.memory_space<vmem>>, %arg15: memref<8x1xf32, #tpu.memory_space<vmem>>, %arg16: memref<8x72xf32, #tpu.memory_space<vmem>>, %arg17: memref<8x1xf32, #tpu.memory_space<vmem>>, %arg18: memref<8x8xf32, #tpu.memory_space<vmem>>, %arg19: memref<8x1xf32, #tpu.memory_space<vmem>>, %arg20: memref<1x8x1xf32, #tpu.memory_space<vmem>>) attributes {dimension_semantics = [#tpu.dimension_semantics<parallel>], iteration_bounds = array<i64: 2>, scalar_prefetch = 0 : i64, scratch_operands = 0 : i64, tpu.core_type = #tpu.core_type<tc>, window_params = [{transform_indices = @transform_0, window_bounds = array<i64: 1, 8, 256>}, {pipeline_mode = #tpu.pipeline_mode<synchronous>, transform_indices = @transform_1, window_bounds = array<i64: 9, 1, 256>}, {pipeline_mode = #tpu.pipeline_mode<synchronous>, transform_indices = @transform_2, window_bounds = array<i64: 9, 1, 256>}, {pipeline_mode = #tpu.pipeline_mode<synchronous>, transform_indices = @transform_3, window_bounds = array<i64: 256, 256>}, {pipeline_mode = #tpu.pipeline_mode<synchronous>, transform_indices = @transform_4, window_bounds = array<i64: 8, 256>}, {pipeline_mode = #tpu.pipeline_mode<synchronous>, transform_indices = @transform_5, window_bounds = array<i64: 8, 72>}, {pipeline_mode = #tpu.pipeline_mode<synchronous>, transform_indices = @transform_6, window_bounds = array<i64: 8, 1>}, {pipeline_mode = #tpu.pipeline_mode<synchronous>, transform_indices = @transform_7, window_bounds = array<i64: 8, 72>}, {pipeline_mode = #tpu.pipeline_mode<synchronous>, transform_indices = @transform_8, window_bounds = array<i64: 8, 1>}, {pipeline_mode = #tpu.pipeline_mode<synchronous>, transform_indices = @transform_9, window_bounds = array<i64: 8, 8>}, {pipeline_mode = #tpu.pipeline_mode<synchronous>, transform_indices = @transform_10, window_bounds = array<i64: 8, 1>}, {pipeline_mode = #tpu.pipeline_mode<synchronous>, transform_indices = @transform_11, window_bounds = array<i64: 8, 72>}, {pipeline_mode = #tpu.pipeline_mode<synchronous>, transform_indices = @transform_12, window_bounds = array<i64: 8, 72>}, {pipeline_mode = #tpu.pipeline_mode<synchronous>, transform_indices = @transform_13, window_bounds = array<i64: 8, 72>}, {pipeline_mode = #tpu.pipeline_mode<synchronous>, transform_indices = @transform_14, window_bounds = array<i64: 8, 1>}, {pipeline_mode = #tpu.pipeline_mode<synchronous>, transform_indices = @transform_15, window_bounds = array<i64: 8, 72>}, {pipeline_mode = #tpu.pipeline_mode<synchronous>, transform_indices = @transform_16, window_bounds = array<i64: 8, 1>}, {pipeline_mode = #tpu.pipeline_mode<synchronous>, transform_indices = @transform_17, window_bounds = array<i64: 8, 8>}, {pipeline_mode = #tpu.pipeline_mode<synchronous>, transform_indices = @transform_18, window_bounds = array<i64: 8, 1>}, {transform_indices = @transform_19, window_bounds = array<i64: 1, 8, 1>}]} {
    %c0 = arith.constant 0 : index
    %c0_0 = arith.constant 0 : index
    %c0_1 = arith.constant 0 : index
    %0 = vector.load %arg1[%c0, %c0_0, %c0_1] : memref<1x8x256xf32, #tpu.memory_space<vmem>>, vector<1x8x256xf32>
    %1 = vector.shape_cast %0 : vector<1x8x256xf32> to vector<8x256xf32>
    %c0_2 = arith.constant 0 : index
    %c0_3 = arith.constant 0 : index
    %2 = vector.load %arg6[%c0_2, %c0_3] : memref<8x72xf32, #tpu.memory_space<vmem>>, vector<8x72xf32>
    %c17_i32 = arith.constant 17 : i32
    %3 = tpu.dynamic_rotate %1 by %c17_i32 dim 1 : vector<8x256xf32>, i32 -> vector<8x256xf32>
    %c0_4 = arith.constant 0 : index
    %c0_5 = arith.constant 0 : index
    %c0_6 = arith.constant 0 : index
    %4 = vector.load %arg2[%c0_4, %c0_5, %c0_6] : memref<9x1x256xf32, #tpu.memory_space<vmem>>, vector<1x1x256xf32>
    %5 = vector.shape_cast %4 : vector<1x1x256xf32> to vector<1x256xf32>
    %6 = vector.broadcast %5 : vector<1x256xf32> to vector<8x256xf32>
    %7 = arith.mulf %3, %6 : vector<8x256xf32>
    %c16_i32 = arith.constant 16 : i32
    %8 = tpu.dynamic_rotate %1 by %c16_i32 dim 1 : vector<8x256xf32>, i32 -> vector<8x256xf32>
    %c1 = arith.constant 1 : index
    %c0_7 = arith.constant 0 : index
    %c0_8 = arith.constant 0 : index
    %9 = vector.load %arg2[%c1, %c0_7, %c0_8] : memref<9x1x256xf32, #tpu.memory_space<vmem>>, vector<1x1x256xf32>
    %10 = vector.shape_cast %9 : vector<1x1x256xf32> to vector<1x256xf32>
    %11 = vector.broadcast %10 : vector<1x256xf32> to vector<8x256xf32>
    %12 = arith.mulf %8, %11 : vector<8x256xf32>
    %c15_i32 = arith.constant 15 : i32
    %13 = tpu.dynamic_rotate %1 by %c15_i32 dim 1 : vector<8x256xf32>, i32 -> vector<8x256xf32>
    %c2 = arith.constant 2 : index
    %c0_9 = arith.constant 0 : index
    %c0_10 = arith.constant 0 : index
    %14 = vector.load %arg2[%c2, %c0_9, %c0_10] : memref<9x1x256xf32, #tpu.memory_space<vmem>>, vector<1x1x256xf32>
    %15 = vector.shape_cast %14 : vector<1x1x256xf32> to vector<1x256xf32>
    %16 = vector.broadcast %15 : vector<1x256xf32> to vector<8x256xf32>
    %17 = arith.mulf %13, %16 : vector<8x256xf32>
    %c1_i32 = arith.constant 1 : i32
    %18 = tpu.dynamic_rotate %1 by %c1_i32 dim 1 : vector<8x256xf32>, i32 -> vector<8x256xf32>
    %c3 = arith.constant 3 : index
    %c0_11 = arith.constant 0 : index
    %c0_12 = arith.constant 0 : index
    %19 = vector.load %arg2[%c3, %c0_11, %c0_12] : memref<9x1x256xf32, #tpu.memory_space<vmem>>, vector<1x1x256xf32>
    %20 = vector.shape_cast %19 : vector<1x1x256xf32> to vector<1x256xf32>
    %21 = vector.broadcast %20 : vector<1x256xf32> to vector<8x256xf32>
    %22 = arith.mulf %18, %21 : vector<8x256xf32>
    %c4 = arith.constant 4 : index
    %c0_13 = arith.constant 0 : index
    %c0_14 = arith.constant 0 : index
    %23 = vector.load %arg2[%c4, %c0_13, %c0_14] : memref<9x1x256xf32, #tpu.memory_space<vmem>>, vector<1x1x256xf32>
    %24 = vector.shape_cast %23 : vector<1x1x256xf32> to vector<1x256xf32>
    %25 = vector.broadcast %24 : vector<1x256xf32> to vector<8x256xf32>
    %26 = arith.mulf %1, %25 : vector<8x256xf32>
    %c255_i32 = arith.constant 255 : i32
    %27 = tpu.dynamic_rotate %1 by %c255_i32 dim 1 : vector<8x256xf32>, i32 -> vector<8x256xf32>
    %c5 = arith.constant 5 : index
    %c0_15 = arith.constant 0 : index
    %c0_16 = arith.constant 0 : index
    %28 = vector.load %arg2[%c5, %c0_15, %c0_16] : memref<9x1x256xf32, #tpu.memory_space<vmem>>, vector<1x1x256xf32>
    %29 = vector.shape_cast %28 : vector<1x1x256xf32> to vector<1x256xf32>
    %30 = vector.broadcast %29 : vector<1x256xf32> to vector<8x256xf32>
    %31 = arith.mulf %27, %30 : vector<8x256xf32>
    %c241_i32 = arith.constant 241 : i32
    %32 = tpu.dynamic_rotate %1 by %c241_i32 dim 1 : vector<8x256xf32>, i32 -> vector<8x256xf32>
    %c6 = arith.constant 6 : index
    %c0_17 = arith.constant 0 : index
    %c0_18 = arith.constant 0 : index
    %33 = vector.load %arg2[%c6, %c0_17, %c0_18] : memref<9x1x256xf32, #tpu.memory_space<vmem>>, vector<1x1x256xf32>
    %34 = vector.shape_cast %33 : vector<1x1x256xf32> to vector<1x256xf32>
    %35 = vector.broadcast %34 : vector<1x256xf32> to vector<8x256xf32>
    %36 = arith.mulf %32, %35 : vector<8x256xf32>
    %c240_i32 = arith.constant 240 : i32
    %37 = tpu.dynamic_rotate %1 by %c240_i32 dim 1 : vector<8x256xf32>, i32 -> vector<8x256xf32>
    %c7 = arith.constant 7 : index
    %c0_19 = arith.constant 0 : index
    %c0_20 = arith.constant 0 : index
    %38 = vector.load %arg2[%c7, %c0_19, %c0_20] : memref<9x1x256xf32, #tpu.memory_space<vmem>>, vector<1x1x256xf32>
    %39 = vector.shape_cast %38 : vector<1x1x256xf32> to vector<1x256xf32>
    %40 = vector.broadcast %39 : vector<1x256xf32> to vector<8x256xf32>
    %41 = arith.mulf %37, %40 : vector<8x256xf32>
    %c239_i32 = arith.constant 239 : i32
    %42 = tpu.dynamic_rotate %1 by %c239_i32 dim 1 : vector<8x256xf32>, i32 -> vector<8x256xf32>
    %c8 = arith.constant 8 : index
    %c0_21 = arith.constant 0 : index
    %c0_22 = arith.constant 0 : index
    %43 = vector.load %arg2[%c8, %c0_21, %c0_22] : memref<9x1x256xf32, #tpu.memory_space<vmem>>, vector<1x1x256xf32>
    %44 = vector.shape_cast %43 : vector<1x1x256xf32> to vector<1x256xf32>
    %45 = vector.broadcast %44 : vector<1x256xf32> to vector<8x256xf32>
    %46 = arith.mulf %42, %45 : vector<8x256xf32>
    %47 = vector.shape_cast %7 : vector<8x256xf32> to vector<1x8x256xf32>
    %48 = vector.shape_cast %12 : vector<8x256xf32> to vector<1x8x256xf32>
    %49 = vector.shape_cast %17 : vector<8x256xf32> to vector<1x8x256xf32>
    %50 = vector.shape_cast %22 : vector<8x256xf32> to vector<1x8x256xf32>
    %51 = vector.shape_cast %26 : vector<8x256xf32> to vector<1x8x256xf32>
    %52 = vector.shape_cast %31 : vector<8x256xf32> to vector<1x8x256xf32>
    %53 = vector.shape_cast %36 : vector<8x256xf32> to vector<1x8x256xf32>
    %54 = vector.shape_cast %41 : vector<8x256xf32> to vector<1x8x256xf32>
    %55 = vector.shape_cast %46 : vector<8x256xf32> to vector<1x8x256xf32>
    %56 = tpu.concatenate %47, %48, %49, %50, %51, %52, %53, %54, %55 in 0 : vector<1x8x256xf32>, vector<1x8x256xf32>, vector<1x8x256xf32>, vector<1x8x256xf32>, vector<1x8x256xf32>, vector<1x8x256xf32>, vector<1x8x256xf32>, vector<1x8x256xf32>, vector<1x8x256xf32> -> vector<9x8x256xf32>
    %57 = vector.shape_cast %56 : vector<9x8x256xf32> to vector<72x256xf32>
    %cst = arith.constant dense<0.000000e+00> : vector<8x256xf32>
    %58 = tpu.matmul %2, %57, %cst {dimension_numbers = #tpu.dot_dimension_numbers<[1], [0], [0], [1], [0, 0, 1, 1], [], []>} : vector<8x72xf32>, vector<72x256xf32>, vector<8x256xf32> -> vector<8x256xf32>
    %c0_23 = arith.constant 0 : index
    %c0_24 = arith.constant 0 : index
    %59 = vector.load %arg7[%c0_23, %c0_24] : memref<8x1xf32, #tpu.memory_space<vmem>>, vector<8x1xf32>
    %60 = vector.broadcast %59 : vector<8x1xf32> to vector<8x256xf32>
    %61 = arith.addf %58, %60 : vector<8x256xf32>
    %cst_25 = arith.constant 0.000000e+00 : f32
    %62 = vector.broadcast %cst_25 : f32 to vector<8x256xf32>
    %63 = arith.maximumf %61, %62 : vector<8x256xf32>
    %c255_i32_26 = arith.constant 255 : i32
    %64 = tpu.dynamic_rotate %63 by %c255_i32_26 dim 1 : vector<8x256xf32>, i32 -> vector<8x256xf32>
    %65 = arith.maximumf %63, %64 : vector<8x256xf32>
    %c240_i32_27 = arith.constant 240 : i32
    %66 = tpu.dynamic_rotate %65 by %c240_i32_27 dim 1 : vector<8x256xf32>, i32 -> vector<8x256xf32>
    %67 = arith.maximumf %65, %66 : vector<8x256xf32>
    %c0_28 = arith.constant 0 : index
    %c0_29 = arith.constant 0 : index
    %68 = vector.load %arg8[%c0_28, %c0_29] : memref<8x72xf32, #tpu.memory_space<vmem>>, vector<8x72xf32>
    %c34_i32 = arith.constant 34 : i32
    %69 = tpu.dynamic_rotate %67 by %c34_i32 dim 1 : vector<8x256xf32>, i32 -> vector<8x256xf32>
    %c0_30 = arith.constant 0 : index
    %c0_31 = arith.constant 0 : index
    %c0_32 = arith.constant 0 : index
    %70 = vector.load %arg3[%c0_30, %c0_31, %c0_32] : memref<9x1x256xf32, #tpu.memory_space<vmem>>, vector<1x1x256xf32>
    %71 = vector.shape_cast %70 : vector<1x1x256xf32> to vector<1x256xf32>
    %72 = vector.broadcast %71 : vector<1x256xf32> to vector<8x256xf32>
    %73 = arith.mulf %69, %72 : vector<8x256xf32>
    %c32_i32 = arith.constant 32 : i32
    %74 = tpu.dynamic_rotate %67 by %c32_i32 dim 1 : vector<8x256xf32>, i32 -> vector<8x256xf32>
    %c1_33 = arith.constant 1 : index
    %c0_34 = arith.constant 0 : index
    %c0_35 = arith.constant 0 : index
    %75 = vector.load %arg3[%c1_33, %c0_34, %c0_35] : memref<9x1x256xf32, #tpu.memory_space<vmem>>, vector<1x1x256xf32>
    %76 = vector.shape_cast %75 : vector<1x1x256xf32> to vector<1x256xf32>
    %77 = vector.broadcast %76 : vector<1x256xf32> to vector<8x256xf32>
    %78 = arith.mulf %74, %77 : vector<8x256xf32>
    %c30_i32 = arith.constant 30 : i32
    %79 = tpu.dynamic_rotate %67 by %c30_i32 dim 1 : vector<8x256xf32>, i32 -> vector<8x256xf32>
    %c2_36 = arith.constant 2 : index
    %c0_37 = arith.constant 0 : index
    %c0_38 = arith.constant 0 : index
    %80 = vector.load %arg3[%c2_36, %c0_37, %c0_38] : memref<9x1x256xf32, #tpu.memory_space<vmem>>, vector<1x1x256xf32>
    %81 = vector.shape_cast %80 : vector<1x1x256xf32> to vector<1x256xf32>
    %82 = vector.broadcast %81 : vector<1x256xf32> to vector<8x256xf32>
    %83 = arith.mulf %79, %82 : vector<8x256xf32>
    %c2_i32 = arith.constant 2 : i32
    %84 = tpu.dynamic_rotate %67 by %c2_i32 dim 1 : vector<8x256xf32>, i32 -> vector<8x256xf32>
    %c3_39 = arith.constant 3 : index
    %c0_40 = arith.constant 0 : index
    %c0_41 = arith.constant 0 : index
    %85 = vector.load %arg3[%c3_39, %c0_40, %c0_41] : memref<9x1x256xf32, #tpu.memory_space<vmem>>, vector<1x1x256xf32>
    %86 = vector.shape_cast %85 : vector<1x1x256xf32> to vector<1x256xf32>
    %87 = vector.broadcast %86 : vector<1x256xf32> to vector<8x256xf32>
    %88 = arith.mulf %84, %87 : vector<8x256xf32>
    %c4_42 = arith.constant 4 : index
    %c0_43 = arith.constant 0 : index
    %c0_44 = arith.constant 0 : index
    %89 = vector.load %arg3[%c4_42, %c0_43, %c0_44] : memref<9x1x256xf32, #tpu.memory_space<vmem>>, vector<1x1x256xf32>
    %90 = vector.shape_cast %89 : vector<1x1x256xf32> to vector<1x256xf32>
    %91 = vector.broadcast %90 : vector<1x256xf32> to vector<8x256xf32>
    %92 = arith.mulf %67, %91 : vector<8x256xf32>
    %c254_i32 = arith.constant 254 : i32
    %93 = tpu.dynamic_rotate %67 by %c254_i32 dim 1 : vector<8x256xf32>, i32 -> vector<8x256xf32>
    %c5_45 = arith.constant 5 : index
    %c0_46 = arith.constant 0 : index
    %c0_47 = arith.constant 0 : index
    %94 = vector.load %arg3[%c5_45, %c0_46, %c0_47] : memref<9x1x256xf32, #tpu.memory_space<vmem>>, vector<1x1x256xf32>
    %95 = vector.shape_cast %94 : vector<1x1x256xf32> to vector<1x256xf32>
    %96 = vector.broadcast %95 : vector<1x256xf32> to vector<8x256xf32>
    %97 = arith.mulf %93, %96 : vector<8x256xf32>
    %c226_i32 = arith.constant 226 : i32
    %98 = tpu.dynamic_rotate %67 by %c226_i32 dim 1 : vector<8x256xf32>, i32 -> vector<8x256xf32>
    %c6_48 = arith.constant 6 : index
    %c0_49 = arith.constant 0 : index
    %c0_50 = arith.constant 0 : index
    %99 = vector.load %arg3[%c6_48, %c0_49, %c0_50] : memref<9x1x256xf32, #tpu.memory_space<vmem>>, vector<1x1x256xf32>
    %100 = vector.shape_cast %99 : vector<1x1x256xf32> to vector<1x256xf32>
    %101 = vector.broadcast %100 : vector<1x256xf32> to vector<8x256xf32>
    %102 = arith.mulf %98, %101 : vector<8x256xf32>
    %c224_i32 = arith.constant 224 : i32
    %103 = tpu.dynamic_rotate %67 by %c224_i32 dim 1 : vector<8x256xf32>, i32 -> vector<8x256xf32>
    %c7_51 = arith.constant 7 : index
    %c0_52 = arith.constant 0 : index
    %c0_53 = arith.constant 0 : index
    %104 = vector.load %arg3[%c7_51, %c0_52, %c0_53] : memref<9x1x256xf32, #tpu.memory_space<vmem>>, vector<1x1x256xf32>
    %105 = vector.shape_cast %104 : vector<1x1x256xf32> to vector<1x256xf32>
    %106 = vector.broadcast %105 : vector<1x256xf32> to vector<8x256xf32>
    %107 = arith.mulf %103, %106 : vector<8x256xf32>
    %c222_i32 = arith.constant 222 : i32
    %108 = tpu.dynamic_rotate %67 by %c222_i32 dim 1 : vector<8x256xf32>, i32 -> vector<8x256xf32>
    %c8_54 = arith.constant 8 : index
    %c0_55 = arith.constant 0 : index
    %c0_56 = arith.constant 0 : index
    %109 = vector.load %arg3[%c8_54, %c0_55, %c0_56] : memref<9x1x256xf32, #tpu.memory_space<vmem>>, vector<1x1x256xf32>
    %110 = vector.shape_cast %109 : vector<1x1x256xf32> to vector<1x256xf32>
    %111 = vector.broadcast %110 : vector<1x256xf32> to vector<8x256xf32>
    %112 = arith.mulf %108, %111 : vector<8x256xf32>
    %113 = vector.shape_cast %73 : vector<8x256xf32> to vector<1x8x256xf32>
    %114 = vector.shape_cast %78 : vector<8x256xf32> to vector<1x8x256xf32>
    %115 = vector.shape_cast %83 : vector<8x256xf32> to vector<1x8x256xf32>
    %116 = vector.shape_cast %88 : vector<8x256xf32> to vector<1x8x256xf32>
    %117 = vector.shape_cast %92 : vector<8x256xf32> to vector<1x8x256xf32>
    %118 = vector.shape_cast %97 : vector<8x256xf32> to vector<1x8x256xf32>
    %119 = vector.shape_cast %102 : vector<8x256xf32> to vector<1x8x256xf32>
    %120 = vector.shape_cast %107 : vector<8x256xf32> to vector<1x8x256xf32>
    %121 = vector.shape_cast %112 : vector<8x256xf32> to vector<1x8x256xf32>
    %122 = tpu.concatenate %113, %114, %115, %116, %117, %118, %119, %120, %121 in 0 : vector<1x8x256xf32>, vector<1x8x256xf32>, vector<1x8x256xf32>, vector<1x8x256xf32>, vector<1x8x256xf32>, vector<1x8x256xf32>, vector<1x8x256xf32>, vector<1x8x256xf32>, vector<1x8x256xf32> -> vector<9x8x256xf32>
    %123 = vector.shape_cast %122 : vector<9x8x256xf32> to vector<72x256xf32>
    %cst_57 = arith.constant dense<0.000000e+00> : vector<8x256xf32>
    %124 = tpu.matmul %68, %123, %cst_57 {dimension_numbers = #tpu.dot_dimension_numbers<[1], [0], [0], [1], [0, 0, 1, 1], [], []>} : vector<8x72xf32>, vector<72x256xf32>, vector<8x256xf32> -> vector<8x256xf32>
    %c0_58 = arith.constant 0 : index
    %c0_59 = arith.constant 0 : index
    %125 = vector.load %arg9[%c0_58, %c0_59] : memref<8x1xf32, #tpu.memory_space<vmem>>, vector<8x1xf32>
    %126 = vector.broadcast %125 : vector<8x1xf32> to vector<8x256xf32>
    %127 = arith.addf %124, %126 : vector<8x256xf32>
    %cst_60 = arith.constant 0.000000e+00 : f32
    %128 = vector.broadcast %cst_60 : f32 to vector<8x256xf32>
    %129 = arith.maximumf %127, %128 : vector<8x256xf32>
    %c254_i32_61 = arith.constant 254 : i32
    %130 = tpu.dynamic_rotate %129 by %c254_i32_61 dim 1 : vector<8x256xf32>, i32 -> vector<8x256xf32>
    %131 = arith.maximumf %129, %130 : vector<8x256xf32>
    %c224_i32_62 = arith.constant 224 : i32
    %132 = tpu.dynamic_rotate %131 by %c224_i32_62 dim 1 : vector<8x256xf32>, i32 -> vector<8x256xf32>
    %133 = arith.maximumf %131, %132 : vector<8x256xf32>
    %c0_63 = arith.constant 0 : index
    %c0_64 = arith.constant 0 : index
    %134 = vector.load %arg10[%c0_63, %c0_64] : memref<8x8xf32, #tpu.memory_space<vmem>>, vector<8x8xf32>
    %cst_65 = arith.constant dense<0.000000e+00> : vector<8x256xf32>
    %135 = tpu.matmul %134, %133, %cst_65 {dimension_numbers = #tpu.dot_dimension_numbers<[1], [0], [0], [1], [0, 0, 1, 1], [], []>} : vector<8x8xf32>, vector<8x256xf32>, vector<8x256xf32> -> vector<8x256xf32>
    %c0_66 = arith.constant 0 : index
    %c0_67 = arith.constant 0 : index
    %136 = vector.load %arg11[%c0_66, %c0_67] : memref<8x1xf32, #tpu.memory_space<vmem>>, vector<8x1xf32>
    %137 = vector.broadcast %136 : vector<8x1xf32> to vector<8x256xf32>
    %138 = arith.addf %135, %137 : vector<8x256xf32>
    %c0_68 = arith.constant 0 : index
    %c0_69 = arith.constant 0 : index
    %139 = vector.load %arg4[%c0_68, %c0_69] : memref<256x256xf32, #tpu.memory_space<vmem>>, vector<256x256xf32>
    %cst_70 = arith.constant dense<0.000000e+00> : vector<8x256xf32>
    %140 = tpu.matmul %138, %139, %cst_70 {dimension_numbers = #tpu.dot_dimension_numbers<[1], [0], [0], [1], [0, 0, 1, 1], [], []>} : vector<8x256xf32>, vector<256x256xf32>, vector<8x256xf32> -> vector<8x256xf32>
    %c0_71 = arith.constant 0 : index
    %c0_72 = arith.constant 0 : index
    %141 = vector.load %arg5[%c0_71, %c0_72] : memref<8x256xf32, #tpu.memory_space<vmem>>, vector<8x256xf32>
    %c0_73 = arith.constant 0 : index
    %c0_74 = arith.constant 0 : index
    %142 = vector.load %arg12[%c0_73, %c0_74] : memref<8x72xf32, #tpu.memory_space<vmem>>, vector<8x72xf32>
    %c17_i32_75 = arith.constant 17 : i32
    %143 = tpu.dynamic_rotate %1 by %c17_i32_75 dim 1 : vector<8x256xf32>, i32 -> vector<8x256xf32>
    %c0_76 = arith.constant 0 : index
    %c0_77 = arith.constant 0 : index
    %c0_78 = arith.constant 0 : index
    %144 = vector.load %arg2[%c0_76, %c0_77, %c0_78] : memref<9x1x256xf32, #tpu.memory_space<vmem>>, vector<1x1x256xf32>
    %145 = vector.shape_cast %144 : vector<1x1x256xf32> to vector<1x256xf32>
    %146 = vector.broadcast %145 : vector<1x256xf32> to vector<8x256xf32>
    %147 = arith.mulf %143, %146 : vector<8x256xf32>
    %c16_i32_79 = arith.constant 16 : i32
    %148 = tpu.dynamic_rotate %1 by %c16_i32_79 dim 1 : vector<8x256xf32>, i32 -> vector<8x256xf32>
    %c1_80 = arith.constant 1 : index
    %c0_81 = arith.constant 0 : index
    %c0_82 = arith.constant 0 : index
    %149 = vector.load %arg2[%c1_80, %c0_81, %c0_82] : memref<9x1x256xf32, #tpu.memory_space<vmem>>, vector<1x1x256xf32>
    %150 = vector.shape_cast %149 : vector<1x1x256xf32> to vector<1x256xf32>
    %151 = vector.broadcast %150 : vector<1x256xf32> to vector<8x256xf32>
    %152 = arith.mulf %148, %151 : vector<8x256xf32>
    %c15_i32_83 = arith.constant 15 : i32
    %153 = tpu.dynamic_rotate %1 by %c15_i32_83 dim 1 : vector<8x256xf32>, i32 -> vector<8x256xf32>
    %c2_84 = arith.constant 2 : index
    %c0_85 = arith.constant 0 : index
    %c0_86 = arith.constant 0 : index
    %154 = vector.load %arg2[%c2_84, %c0_85, %c0_86] : memref<9x1x256xf32, #tpu.memory_space<vmem>>, vector<1x1x256xf32>
    %155 = vector.shape_cast %154 : vector<1x1x256xf32> to vector<1x256xf32>
    %156 = vector.broadcast %155 : vector<1x256xf32> to vector<8x256xf32>
    %157 = arith.mulf %153, %156 : vector<8x256xf32>
    %c1_i32_87 = arith.constant 1 : i32
    %158 = tpu.dynamic_rotate %1 by %c1_i32_87 dim 1 : vector<8x256xf32>, i32 -> vector<8x256xf32>
    %c3_88 = arith.constant 3 : index
    %c0_89 = arith.constant 0 : index
    %c0_90 = arith.constant 0 : index
    %159 = vector.load %arg2[%c3_88, %c0_89, %c0_90] : memref<9x1x256xf32, #tpu.memory_space<vmem>>, vector<1x1x256xf32>
    %160 = vector.shape_cast %159 : vector<1x1x256xf32> to vector<1x256xf32>
    %161 = vector.broadcast %160 : vector<1x256xf32> to vector<8x256xf32>
    %162 = arith.mulf %158, %161 : vector<8x256xf32>
    %c4_91 = arith.constant 4 : index
    %c0_92 = arith.constant 0 : index
    %c0_93 = arith.constant 0 : index
    %163 = vector.load %arg2[%c4_91, %c0_92, %c0_93] : memref<9x1x256xf32, #tpu.memory_space<vmem>>, vector<1x1x256xf32>
    %164 = vector.shape_cast %163 : vector<1x1x256xf32> to vector<1x256xf32>
    %165 = vector.broadcast %164 : vector<1x256xf32> to vector<8x256xf32>
    %166 = arith.mulf %1, %165 : vector<8x256xf32>
    %c255_i32_94 = arith.constant 255 : i32
    %167 = tpu.dynamic_rotate %1 by %c255_i32_94 dim 1 : vector<8x256xf32>, i32 -> vector<8x256xf32>
    %c5_95 = arith.constant 5 : index
    %c0_96 = arith.constant 0 : index
    %c0_97 = arith.constant 0 : index
    %168 = vector.load %arg2[%c5_95, %c0_96, %c0_97] : memref<9x1x256xf32, #tpu.memory_space<vmem>>, vector<1x1x256xf32>
    %169 = vector.shape_cast %168 : vector<1x1x256xf32> to vector<1x256xf32>
    %170 = vector.broadcast %169 : vector<1x256xf32> to vector<8x256xf32>
    %171 = arith.mulf %167, %170 : vector<8x256xf32>
    %c241_i32_98 = arith.constant 241 : i32
    %172 = tpu.dynamic_rotate %1 by %c241_i32_98 dim 1 : vector<8x256xf32>, i32 -> vector<8x256xf32>
    %c6_99 = arith.constant 6 : index
    %c0_100 = arith.constant 0 : index
    %c0_101 = arith.constant 0 : index
    %173 = vector.load %arg2[%c6_99, %c0_100, %c0_101] : memref<9x1x256xf32, #tpu.memory_space<vmem>>, vector<1x1x256xf32>
    %174 = vector.shape_cast %173 : vector<1x1x256xf32> to vector<1x256xf32>
    %175 = vector.broadcast %174 : vector<1x256xf32> to vector<8x256xf32>
    %176 = arith.mulf %172, %175 : vector<8x256xf32>
    %c240_i32_102 = arith.constant 240 : i32
    %177 = tpu.dynamic_rotate %1 by %c240_i32_102 dim 1 : vector<8x256xf32>, i32 -> vector<8x256xf32>
    %c7_103 = arith.constant 7 : index
    %c0_104 = arith.constant 0 : index
    %c0_105 = arith.constant 0 : index
    %178 = vector.load %arg2[%c7_103, %c0_104, %c0_105] : memref<9x1x256xf32, #tpu.memory_space<vmem>>, vector<1x1x256xf32>
    %179 = vector.shape_cast %178 : vector<1x1x256xf32> to vector<1x256xf32>
    %180 = vector.broadcast %179 : vector<1x256xf32> to vector<8x256xf32>
    %181 = arith.mulf %177, %180 : vector<8x256xf32>
    %c239_i32_106 = arith.constant 239 : i32
    %182 = tpu.dynamic_rotate %1 by %c239_i32_106 dim 1 : vector<8x256xf32>, i32 -> vector<8x256xf32>
    %c8_107 = arith.constant 8 : index
    %c0_108 = arith.constant 0 : index
    %c0_109 = arith.constant 0 : index
    %183 = vector.load %arg2[%c8_107, %c0_108, %c0_109] : memref<9x1x256xf32, #tpu.memory_space<vmem>>, vector<1x1x256xf32>
    %184 = vector.shape_cast %183 : vector<1x1x256xf32> to vector<1x256xf32>
    %185 = vector.broadcast %184 : vector<1x256xf32> to vector<8x256xf32>
    %186 = arith.mulf %182, %185 : vector<8x256xf32>
    %187 = vector.shape_cast %147 : vector<8x256xf32> to vector<1x8x256xf32>
    %188 = vector.shape_cast %152 : vector<8x256xf32> to vector<1x8x256xf32>
    %189 = vector.shape_cast %157 : vector<8x256xf32> to vector<1x8x256xf32>
    %190 = vector.shape_cast %162 : vector<8x256xf32> to vector<1x8x256xf32>
    %191 = vector.shape_cast %166 : vector<8x256xf32> to vector<1x8x256xf32>
    %192 = vector.shape_cast %171 : vector<8x256xf32> to vector<1x8x256xf32>
    %193 = vector.shape_cast %176 : vector<8x256xf32> to vector<1x8x256xf32>
    %194 = vector.shape_cast %181 : vector<8x256xf32> to vector<1x8x256xf32>
    %195 = vector.shape_cast %186 : vector<8x256xf32> to vector<1x8x256xf32>
    %196 = tpu.concatenate %187, %188, %189, %190, %191, %192, %193, %194, %195 in 0 : vector<1x8x256xf32>, vector<1x8x256xf32>, vector<1x8x256xf32>, vector<1x8x256xf32>, vector<1x8x256xf32>, vector<1x8x256xf32>, vector<1x8x256xf32>, vector<1x8x256xf32>, vector<1x8x256xf32> -> vector<9x8x256xf32>
    %197 = vector.shape_cast %196 : vector<9x8x256xf32> to vector<72x256xf32>
    %cst_110 = arith.constant dense<0.000000e+00> : vector<8x256xf32>
    %198 = tpu.matmul %142, %197, %cst_110 {dimension_numbers = #tpu.dot_dimension_numbers<[1], [0], [0], [1], [0, 0, 1, 1], [], []>} : vector<8x72xf32>, vector<72x256xf32>, vector<8x256xf32> -> vector<8x256xf32>
    %c0_111 = arith.constant 0 : index
    %c0_112 = arith.constant 0 : index
    %199 = vector.load %arg13[%c0_111, %c0_112] : memref<8x72xf32, #tpu.memory_space<vmem>>, vector<8x72xf32>
    %c17_i32_113 = arith.constant 17 : i32
    %200 = tpu.dynamic_rotate %140 by %c17_i32_113 dim 1 : vector<8x256xf32>, i32 -> vector<8x256xf32>
    %c0_114 = arith.constant 0 : index
    %c0_115 = arith.constant 0 : index
    %c0_116 = arith.constant 0 : index
    %201 = vector.load %arg2[%c0_114, %c0_115, %c0_116] : memref<9x1x256xf32, #tpu.memory_space<vmem>>, vector<1x1x256xf32>
    %202 = vector.shape_cast %201 : vector<1x1x256xf32> to vector<1x256xf32>
    %203 = vector.broadcast %202 : vector<1x256xf32> to vector<8x256xf32>
    %204 = arith.mulf %200, %203 : vector<8x256xf32>
    %c16_i32_117 = arith.constant 16 : i32
    %205 = tpu.dynamic_rotate %140 by %c16_i32_117 dim 1 : vector<8x256xf32>, i32 -> vector<8x256xf32>
    %c1_118 = arith.constant 1 : index
    %c0_119 = arith.constant 0 : index
    %c0_120 = arith.constant 0 : index
    %206 = vector.load %arg2[%c1_118, %c0_119, %c0_120] : memref<9x1x256xf32, #tpu.memory_space<vmem>>, vector<1x1x256xf32>
    %207 = vector.shape_cast %206 : vector<1x1x256xf32> to vector<1x256xf32>
    %208 = vector.broadcast %207 : vector<1x256xf32> to vector<8x256xf32>
    %209 = arith.mulf %205, %208 : vector<8x256xf32>
    %c15_i32_121 = arith.constant 15 : i32
    %210 = tpu.dynamic_rotate %140 by %c15_i32_121 dim 1 : vector<8x256xf32>, i32 -> vector<8x256xf32>
    %c2_122 = arith.constant 2 : index
    %c0_123 = arith.constant 0 : index
    %c0_124 = arith.constant 0 : index
    %211 = vector.load %arg2[%c2_122, %c0_123, %c0_124] : memref<9x1x256xf32, #tpu.memory_space<vmem>>, vector<1x1x256xf32>
    %212 = vector.shape_cast %211 : vector<1x1x256xf32> to vector<1x256xf32>
    %213 = vector.broadcast %212 : vector<1x256xf32> to vector<8x256xf32>
    %214 = arith.mulf %210, %213 : vector<8x256xf32>
    %c1_i32_125 = arith.constant 1 : i32
    %215 = tpu.dynamic_rotate %140 by %c1_i32_125 dim 1 : vector<8x256xf32>, i32 -> vector<8x256xf32>
    %c3_126 = arith.constant 3 : index
    %c0_127 = arith.constant 0 : index
    %c0_128 = arith.constant 0 : index
    %216 = vector.load %arg2[%c3_126, %c0_127, %c0_128] : memref<9x1x256xf32, #tpu.memory_space<vmem>>, vector<1x1x256xf32>
    %217 = vector.shape_cast %216 : vector<1x1x256xf32> to vector<1x256xf32>
    %218 = vector.broadcast %217 : vector<1x256xf32> to vector<8x256xf32>
    %219 = arith.mulf %215, %218 : vector<8x256xf32>
    %c4_129 = arith.constant 4 : index
    %c0_130 = arith.constant 0 : index
    %c0_131 = arith.constant 0 : index
    %220 = vector.load %arg2[%c4_129, %c0_130, %c0_131] : memref<9x1x256xf32, #tpu.memory_space<vmem>>, vector<1x1x256xf32>
    %221 = vector.shape_cast %220 : vector<1x1x256xf32> to vector<1x256xf32>
    %222 = vector.broadcast %221 : vector<1x256xf32> to vector<8x256xf32>
    %223 = arith.mulf %140, %222 : vector<8x256xf32>
    %c255_i32_132 = arith.constant 255 : i32
    %224 = tpu.dynamic_rotate %140 by %c255_i32_132 dim 1 : vector<8x256xf32>, i32 -> vector<8x256xf32>
    %c5_133 = arith.constant 5 : index
    %c0_134 = arith.constant 0 : index
    %c0_135 = arith.constant 0 : index
    %225 = vector.load %arg2[%c5_133, %c0_134, %c0_135] : memref<9x1x256xf32, #tpu.memory_space<vmem>>, vector<1x1x256xf32>
    %226 = vector.shape_cast %225 : vector<1x1x256xf32> to vector<1x256xf32>
    %227 = vector.broadcast %226 : vector<1x256xf32> to vector<8x256xf32>
    %228 = arith.mulf %224, %227 : vector<8x256xf32>
    %c241_i32_136 = arith.constant 241 : i32
    %229 = tpu.dynamic_rotate %140 by %c241_i32_136 dim 1 : vector<8x256xf32>, i32 -> vector<8x256xf32>
    %c6_137 = arith.constant 6 : index
    %c0_138 = arith.constant 0 : index
    %c0_139 = arith.constant 0 : index
    %230 = vector.load %arg2[%c6_137, %c0_138, %c0_139] : memref<9x1x256xf32, #tpu.memory_space<vmem>>, vector<1x1x256xf32>
    %231 = vector.shape_cast %230 : vector<1x1x256xf32> to vector<1x256xf32>
    %232 = vector.broadcast %231 : vector<1x256xf32> to vector<8x256xf32>
    %233 = arith.mulf %229, %232 : vector<8x256xf32>
    %c240_i32_140 = arith.constant 240 : i32
    %234 = tpu.dynamic_rotate %140 by %c240_i32_140 dim 1 : vector<8x256xf32>, i32 -> vector<8x256xf32>
    %c7_141 = arith.constant 7 : index
    %c0_142 = arith.constant 0 : index
    %c0_143 = arith.constant 0 : index
    %235 = vector.load %arg2[%c7_141, %c0_142, %c0_143] : memref<9x1x256xf32, #tpu.memory_space<vmem>>, vector<1x1x256xf32>
    %236 = vector.shape_cast %235 : vector<1x1x256xf32> to vector<1x256xf32>
    %237 = vector.broadcast %236 : vector<1x256xf32> to vector<8x256xf32>
    %238 = arith.mulf %234, %237 : vector<8x256xf32>
    %c239_i32_144 = arith.constant 239 : i32
    %239 = tpu.dynamic_rotate %140 by %c239_i32_144 dim 1 : vector<8x256xf32>, i32 -> vector<8x256xf32>
    %c8_145 = arith.constant 8 : index
    %c0_146 = arith.constant 0 : index
    %c0_147 = arith.constant 0 : index
    %240 = vector.load %arg2[%c8_145, %c0_146, %c0_147] : memref<9x1x256xf32, #tpu.memory_space<vmem>>, vector<1x1x256xf32>
    %241 = vector.shape_cast %240 : vector<1x1x256xf32> to vector<1x256xf32>
    %242 = vector.broadcast %241 : vector<1x256xf32> to vector<8x256xf32>
    %243 = arith.mulf %239, %242 : vector<8x256xf32>
    %244 = vector.shape_cast %204 : vector<8x256xf32> to vector<1x8x256xf32>
    %245 = vector.shape_cast %209 : vector<8x256xf32> to vector<1x8x256xf32>
    %246 = vector.shape_cast %214 : vector<8x256xf32> to vector<1x8x256xf32>
    %247 = vector.shape_cast %219 : vector<8x256xf32> to vector<1x8x256xf32>
    %248 = vector.shape_cast %223 : vector<8x256xf32> to vector<1x8x256xf32>
    %249 = vector.shape_cast %228 : vector<8x256xf32> to vector<1x8x256xf32>
    %250 = vector.shape_cast %233 : vector<8x256xf32> to vector<1x8x256xf32>
    %251 = vector.shape_cast %238 : vector<8x256xf32> to vector<1x8x256xf32>
    %252 = vector.shape_cast %243 : vector<8x256xf32> to vector<1x8x256xf32>
    %253 = tpu.concatenate %244, %245, %246, %247, %248, %249, %250, %251, %252 in 0 : vector<1x8x256xf32>, vector<1x8x256xf32>, vector<1x8x256xf32>, vector<1x8x256xf32>, vector<1x8x256xf32>, vector<1x8x256xf32>, vector<1x8x256xf32>, vector<1x8x256xf32>, vector<1x8x256xf32> -> vector<9x8x256xf32>
    %254 = vector.shape_cast %253 : vector<9x8x256xf32> to vector<72x256xf32>
    %cst_148 = arith.constant dense<0.000000e+00> : vector<8x256xf32>
    %255 = tpu.matmul %199, %254, %cst_148 {dimension_numbers = #tpu.dot_dimension_numbers<[1], [0], [0], [1], [0, 0, 1, 1], [], []>} : vector<8x72xf32>, vector<72x256xf32>, vector<8x256xf32> -> vector<8x256xf32>
    %256 = arith.addf %198, %255 : vector<8x256xf32>
    %c0_149 = arith.constant 0 : index
    %c0_150 = arith.constant 0 : index
    %257 = vector.load %arg14[%c0_149, %c0_150] : memref<8x72xf32, #tpu.memory_space<vmem>>, vector<8x72xf32>
    %c17_i32_151 = arith.constant 17 : i32
    %258 = tpu.dynamic_rotate %141 by %c17_i32_151 dim 1 : vector<8x256xf32>, i32 -> vector<8x256xf32>
    %c0_152 = arith.constant 0 : index
    %c0_153 = arith.constant 0 : index
    %c0_154 = arith.constant 0 : index
    %259 = vector.load %arg2[%c0_152, %c0_153, %c0_154] : memref<9x1x256xf32, #tpu.memory_space<vmem>>, vector<1x1x256xf32>
    %260 = vector.shape_cast %259 : vector<1x1x256xf32> to vector<1x256xf32>
    %261 = vector.broadcast %260 : vector<1x256xf32> to vector<8x256xf32>
    %262 = arith.mulf %258, %261 : vector<8x256xf32>
    %c16_i32_155 = arith.constant 16 : i32
    %263 = tpu.dynamic_rotate %141 by %c16_i32_155 dim 1 : vector<8x256xf32>, i32 -> vector<8x256xf32>
    %c1_156 = arith.constant 1 : index
    %c0_157 = arith.constant 0 : index
    %c0_158 = arith.constant 0 : index
    %264 = vector.load %arg2[%c1_156, %c0_157, %c0_158] : memref<9x1x256xf32, #tpu.memory_space<vmem>>, vector<1x1x256xf32>
    %265 = vector.shape_cast %264 : vector<1x1x256xf32> to vector<1x256xf32>
    %266 = vector.broadcast %265 : vector<1x256xf32> to vector<8x256xf32>
    %267 = arith.mulf %263, %266 : vector<8x256xf32>
    %c15_i32_159 = arith.constant 15 : i32
    %268 = tpu.dynamic_rotate %141 by %c15_i32_159 dim 1 : vector<8x256xf32>, i32 -> vector<8x256xf32>
    %c2_160 = arith.constant 2 : index
    %c0_161 = arith.constant 0 : index
    %c0_162 = arith.constant 0 : index
    %269 = vector.load %arg2[%c2_160, %c0_161, %c0_162] : memref<9x1x256xf32, #tpu.memory_space<vmem>>, vector<1x1x256xf32>
    %270 = vector.shape_cast %269 : vector<1x1x256xf32> to vector<1x256xf32>
    %271 = vector.broadcast %270 : vector<1x256xf32> to vector<8x256xf32>
    %272 = arith.mulf %268, %271 : vector<8x256xf32>
    %c1_i32_163 = arith.constant 1 : i32
    %273 = tpu.dynamic_rotate %141 by %c1_i32_163 dim 1 : vector<8x256xf32>, i32 -> vector<8x256xf32>
    %c3_164 = arith.constant 3 : index
    %c0_165 = arith.constant 0 : index
    %c0_166 = arith.constant 0 : index
    %274 = vector.load %arg2[%c3_164, %c0_165, %c0_166] : memref<9x1x256xf32, #tpu.memory_space<vmem>>, vector<1x1x256xf32>
    %275 = vector.shape_cast %274 : vector<1x1x256xf32> to vector<1x256xf32>
    %276 = vector.broadcast %275 : vector<1x256xf32> to vector<8x256xf32>
    %277 = arith.mulf %273, %276 : vector<8x256xf32>
    %c4_167 = arith.constant 4 : index
    %c0_168 = arith.constant 0 : index
    %c0_169 = arith.constant 0 : index
    %278 = vector.load %arg2[%c4_167, %c0_168, %c0_169] : memref<9x1x256xf32, #tpu.memory_space<vmem>>, vector<1x1x256xf32>
    %279 = vector.shape_cast %278 : vector<1x1x256xf32> to vector<1x256xf32>
    %280 = vector.broadcast %279 : vector<1x256xf32> to vector<8x256xf32>
    %281 = arith.mulf %141, %280 : vector<8x256xf32>
    %c255_i32_170 = arith.constant 255 : i32
    %282 = tpu.dynamic_rotate %141 by %c255_i32_170 dim 1 : vector<8x256xf32>, i32 -> vector<8x256xf32>
    %c5_171 = arith.constant 5 : index
    %c0_172 = arith.constant 0 : index
    %c0_173 = arith.constant 0 : index
    %283 = vector.load %arg2[%c5_171, %c0_172, %c0_173] : memref<9x1x256xf32, #tpu.memory_space<vmem>>, vector<1x1x256xf32>
    %284 = vector.shape_cast %283 : vector<1x1x256xf32> to vector<1x256xf32>
    %285 = vector.broadcast %284 : vector<1x256xf32> to vector<8x256xf32>
    %286 = arith.mulf %282, %285 : vector<8x256xf32>
    %c241_i32_174 = arith.constant 241 : i32
    %287 = tpu.dynamic_rotate %141 by %c241_i32_174 dim 1 : vector<8x256xf32>, i32 -> vector<8x256xf32>
    %c6_175 = arith.constant 6 : index
    %c0_176 = arith.constant 0 : index
    %c0_177 = arith.constant 0 : index
    %288 = vector.load %arg2[%c6_175, %c0_176, %c0_177] : memref<9x1x256xf32, #tpu.memory_space<vmem>>, vector<1x1x256xf32>
    %289 = vector.shape_cast %288 : vector<1x1x256xf32> to vector<1x256xf32>
    %290 = vector.broadcast %289 : vector<1x256xf32> to vector<8x256xf32>
    %291 = arith.mulf %287, %290 : vector<8x256xf32>
    %c240_i32_178 = arith.constant 240 : i32
    %292 = tpu.dynamic_rotate %141 by %c240_i32_178 dim 1 : vector<8x256xf32>, i32 -> vector<8x256xf32>
    %c7_179 = arith.constant 7 : index
    %c0_180 = arith.constant 0 : index
    %c0_181 = arith.constant 0 : index
    %293 = vector.load %arg2[%c7_179, %c0_180, %c0_181] : memref<9x1x256xf32, #tpu.memory_space<vmem>>, vector<1x1x256xf32>
    %294 = vector.shape_cast %293 : vector<1x1x256xf32> to vector<1x256xf32>
    %295 = vector.broadcast %294 : vector<1x256xf32> to vector<8x256xf32>
    %296 = arith.mulf %292, %295 : vector<8x256xf32>
    %c239_i32_182 = arith.constant 239 : i32
    %297 = tpu.dynamic_rotate %141 by %c239_i32_182 dim 1 : vector<8x256xf32>, i32 -> vector<8x256xf32>
    %c8_183 = arith.constant 8 : index
    %c0_184 = arith.constant 0 : index
    %c0_185 = arith.constant 0 : index
    %298 = vector.load %arg2[%c8_183, %c0_184, %c0_185] : memref<9x1x256xf32, #tpu.memory_space<vmem>>, vector<1x1x256xf32>
    %299 = vector.shape_cast %298 : vector<1x1x256xf32> to vector<1x256xf32>
    %300 = vector.broadcast %299 : vector<1x256xf32> to vector<8x256xf32>
    %301 = arith.mulf %297, %300 : vector<8x256xf32>
    %302 = vector.shape_cast %262 : vector<8x256xf32> to vector<1x8x256xf32>
    %303 = vector.shape_cast %267 : vector<8x256xf32> to vector<1x8x256xf32>
    %304 = vector.shape_cast %272 : vector<8x256xf32> to vector<1x8x256xf32>
    %305 = vector.shape_cast %277 : vector<8x256xf32> to vector<1x8x256xf32>
    %306 = vector.shape_cast %281 : vector<8x256xf32> to vector<1x8x256xf32>
    %307 = vector.shape_cast %286 : vector<8x256xf32> to vector<1x8x256xf32>
    %308 = vector.shape_cast %291 : vector<8x256xf32> to vector<1x8x256xf32>
    %309 = vector.shape_cast %296 : vector<8x256xf32> to vector<1x8x256xf32>
    %310 = vector.shape_cast %301 : vector<8x256xf32> to vector<1x8x256xf32>
    %311 = tpu.concatenate %302, %303, %304, %305, %306, %307, %308, %309, %310 in 0 : vector<1x8x256xf32>, vector<1x8x256xf32>, vector<1x8x256xf32>, vector<1x8x256xf32>, vector<1x8x256xf32>, vector<1x8x256xf32>, vector<1x8x256xf32>, vector<1x8x256xf32>, vector<1x8x256xf32> -> vector<9x8x256xf32>
    %312 = vector.shape_cast %311 : vector<9x8x256xf32> to vector<72x256xf32>
    %cst_186 = arith.constant dense<0.000000e+00> : vector<8x256xf32>
    %313 = tpu.matmul %257, %312, %cst_186 {dimension_numbers = #tpu.dot_dimension_numbers<[1], [0], [0], [1], [0, 0, 1, 1], [], []>} : vector<8x72xf32>, vector<72x256xf32>, vector<8x256xf32> -> vector<8x256xf32>
    %314 = arith.addf %256, %313 : vector<8x256xf32>
    %c0_187 = arith.constant 0 : index
    %c0_188 = arith.constant 0 : index
    %315 = vector.load %arg15[%c0_187, %c0_188] : memref<8x1xf32, #tpu.memory_space<vmem>>, vector<8x1xf32>
    %316 = vector.broadcast %315 : vector<8x1xf32> to vector<8x256xf32>
    %317 = arith.addf %314, %316 : vector<8x256xf32>
    %cst_189 = arith.constant 0.000000e+00 : f32
    %318 = vector.broadcast %cst_189 : f32 to vector<8x256xf32>
    %319 = arith.maximumf %317, %318 : vector<8x256xf32>
    %c0_190 = arith.constant 0 : index
    %c0_191 = arith.constant 0 : index
    %320 = vector.load %arg16[%c0_190, %c0_191] : memref<8x72xf32, #tpu.memory_space<vmem>>, vector<8x72xf32>
    %c17_i32_192 = arith.constant 17 : i32
    %321 = tpu.dynamic_rotate %319 by %c17_i32_192 dim 1 : vector<8x256xf32>, i32 -> vector<8x256xf32>
    %c0_193 = arith.constant 0 : index
    %c0_194 = arith.constant 0 : index
    %c0_195 = arith.constant 0 : index
    %322 = vector.load %arg2[%c0_193, %c0_194, %c0_195] : memref<9x1x256xf32, #tpu.memory_space<vmem>>, vector<1x1x256xf32>
    %323 = vector.shape_cast %322 : vector<1x1x256xf32> to vector<1x256xf32>
    %324 = vector.broadcast %323 : vector<1x256xf32> to vector<8x256xf32>
    %325 = arith.mulf %321, %324 : vector<8x256xf32>
    %c16_i32_196 = arith.constant 16 : i32
    %326 = tpu.dynamic_rotate %319 by %c16_i32_196 dim 1 : vector<8x256xf32>, i32 -> vector<8x256xf32>
    %c1_197 = arith.constant 1 : index
    %c0_198 = arith.constant 0 : index
    %c0_199 = arith.constant 0 : index
    %327 = vector.load %arg2[%c1_197, %c0_198, %c0_199] : memref<9x1x256xf32, #tpu.memory_space<vmem>>, vector<1x1x256xf32>
    %328 = vector.shape_cast %327 : vector<1x1x256xf32> to vector<1x256xf32>
    %329 = vector.broadcast %328 : vector<1x256xf32> to vector<8x256xf32>
    %330 = arith.mulf %326, %329 : vector<8x256xf32>
    %c15_i32_200 = arith.constant 15 : i32
    %331 = tpu.dynamic_rotate %319 by %c15_i32_200 dim 1 : vector<8x256xf32>, i32 -> vector<8x256xf32>
    %c2_201 = arith.constant 2 : index
    %c0_202 = arith.constant 0 : index
    %c0_203 = arith.constant 0 : index
    %332 = vector.load %arg2[%c2_201, %c0_202, %c0_203] : memref<9x1x256xf32, #tpu.memory_space<vmem>>, vector<1x1x256xf32>
    %333 = vector.shape_cast %332 : vector<1x1x256xf32> to vector<1x256xf32>
    %334 = vector.broadcast %333 : vector<1x256xf32> to vector<8x256xf32>
    %335 = arith.mulf %331, %334 : vector<8x256xf32>
    %c1_i32_204 = arith.constant 1 : i32
    %336 = tpu.dynamic_rotate %319 by %c1_i32_204 dim 1 : vector<8x256xf32>, i32 -> vector<8x256xf32>
    %c3_205 = arith.constant 3 : index
    %c0_206 = arith.constant 0 : index
    %c0_207 = arith.constant 0 : index
    %337 = vector.load %arg2[%c3_205, %c0_206, %c0_207] : memref<9x1x256xf32, #tpu.memory_space<vmem>>, vector<1x1x256xf32>
    %338 = vector.shape_cast %337 : vector<1x1x256xf32> to vector<1x256xf32>
    %339 = vector.broadcast %338 : vector<1x256xf32> to vector<8x256xf32>
    %340 = arith.mulf %336, %339 : vector<8x256xf32>
    %c4_208 = arith.constant 4 : index
    %c0_209 = arith.constant 0 : index
    %c0_210 = arith.constant 0 : index
    %341 = vector.load %arg2[%c4_208, %c0_209, %c0_210] : memref<9x1x256xf32, #tpu.memory_space<vmem>>, vector<1x1x256xf32>
    %342 = vector.shape_cast %341 : vector<1x1x256xf32> to vector<1x256xf32>
    %343 = vector.broadcast %342 : vector<1x256xf32> to vector<8x256xf32>
    %344 = arith.mulf %319, %343 : vector<8x256xf32>
    %c255_i32_211 = arith.constant 255 : i32
    %345 = tpu.dynamic_rotate %319 by %c255_i32_211 dim 1 : vector<8x256xf32>, i32 -> vector<8x256xf32>
    %c5_212 = arith.constant 5 : index
    %c0_213 = arith.constant 0 : index
    %c0_214 = arith.constant 0 : index
    %346 = vector.load %arg2[%c5_212, %c0_213, %c0_214] : memref<9x1x256xf32, #tpu.memory_space<vmem>>, vector<1x1x256xf32>
    %347 = vector.shape_cast %346 : vector<1x1x256xf32> to vector<1x256xf32>
    %348 = vector.broadcast %347 : vector<1x256xf32> to vector<8x256xf32>
    %349 = arith.mulf %345, %348 : vector<8x256xf32>
    %c241_i32_215 = arith.constant 241 : i32
    %350 = tpu.dynamic_rotate %319 by %c241_i32_215 dim 1 : vector<8x256xf32>, i32 -> vector<8x256xf32>
    %c6_216 = arith.constant 6 : index
    %c0_217 = arith.constant 0 : index
    %c0_218 = arith.constant 0 : index
    %351 = vector.load %arg2[%c6_216, %c0_217, %c0_218] : memref<9x1x256xf32, #tpu.memory_space<vmem>>, vector<1x1x256xf32>
    %352 = vector.shape_cast %351 : vector<1x1x256xf32> to vector<1x256xf32>
    %353 = vector.broadcast %352 : vector<1x256xf32> to vector<8x256xf32>
    %354 = arith.mulf %350, %353 : vector<8x256xf32>
    %c240_i32_219 = arith.constant 240 : i32
    %355 = tpu.dynamic_rotate %319 by %c240_i32_219 dim 1 : vector<8x256xf32>, i32 -> vector<8x256xf32>
    %c7_220 = arith.constant 7 : index
    %c0_221 = arith.constant 0 : index
    %c0_222 = arith.constant 0 : index
    %356 = vector.load %arg2[%c7_220, %c0_221, %c0_222] : memref<9x1x256xf32, #tpu.memory_space<vmem>>, vector<1x1x256xf32>
    %357 = vector.shape_cast %356 : vector<1x1x256xf32> to vector<1x256xf32>
    %358 = vector.broadcast %357 : vector<1x256xf32> to vector<8x256xf32>
    %359 = arith.mulf %355, %358 : vector<8x256xf32>
    %c239_i32_223 = arith.constant 239 : i32
    %360 = tpu.dynamic_rotate %319 by %c239_i32_223 dim 1 : vector<8x256xf32>, i32 -> vector<8x256xf32>
    %c8_224 = arith.constant 8 : index
    %c0_225 = arith.constant 0 : index
    %c0_226 = arith.constant 0 : index
    %361 = vector.load %arg2[%c8_224, %c0_225, %c0_226] : memref<9x1x256xf32, #tpu.memory_space<vmem>>, vector<1x1x256xf32>
    %362 = vector.shape_cast %361 : vector<1x1x256xf32> to vector<1x256xf32>
    %363 = vector.broadcast %362 : vector<1x256xf32> to vector<8x256xf32>
    %364 = arith.mulf %360, %363 : vector<8x256xf32>
    %365 = vector.shape_cast %325 : vector<8x256xf32> to vector<1x8x256xf32>
    %366 = vector.shape_cast %330 : vector<8x256xf32> to vector<1x8x256xf32>
    %367 = vector.shape_cast %335 : vector<8x256xf32> to vector<1x8x256xf32>
    %368 = vector.shape_cast %340 : vector<8x256xf32> to vector<1x8x256xf32>
    %369 = vector.shape_cast %344 : vector<8x256xf32> to vector<1x8x256xf32>
    %370 = vector.shape_cast %349 : vector<8x256xf32> to vector<1x8x256xf32>
    %371 = vector.shape_cast %354 : vector<8x256xf32> to vector<1x8x256xf32>
    %372 = vector.shape_cast %359 : vector<8x256xf32> to vector<1x8x256xf32>
    %373 = vector.shape_cast %364 : vector<8x256xf32> to vector<1x8x256xf32>
    %374 = tpu.concatenate %365, %366, %367, %368, %369, %370, %371, %372, %373 in 0 : vector<1x8x256xf32>, vector<1x8x256xf32>, vector<1x8x256xf32>, vector<1x8x256xf32>, vector<1x8x256xf32>, vector<1x8x256xf32>, vector<1x8x256xf32>, vector<1x8x256xf32>, vector<1x8x256xf32> -> vector<9x8x256xf32>
    %375 = vector.shape_cast %374 : vector<9x8x256xf32> to vector<72x256xf32>
    %cst_227 = arith.constant dense<0.000000e+00> : vector<8x256xf32>
    %376 = tpu.matmul %320, %375, %cst_227 {dimension_numbers = #tpu.dot_dimension_numbers<[1], [0], [0], [1], [0, 0, 1, 1], [], []>} : vector<8x72xf32>, vector<72x256xf32>, vector<8x256xf32> -> vector<8x256xf32>
    %c0_228 = arith.constant 0 : index
    %c0_229 = arith.constant 0 : index
    %377 = vector.load %arg17[%c0_228, %c0_229] : memref<8x1xf32, #tpu.memory_space<vmem>>, vector<8x1xf32>
    %378 = vector.broadcast %377 : vector<8x1xf32> to vector<8x256xf32>
    %379 = arith.addf %376, %378 : vector<8x256xf32>
    %cst_230 = arith.constant 0.000000e+00 : f32
    %380 = vector.broadcast %cst_230 : f32 to vector<8x256xf32>
    %381 = arith.maximumf %379, %380 : vector<8x256xf32>
    %c0_231 = arith.constant 0 : index
    %c0_232 = arith.constant 0 : index
    %382 = vector.load %arg18[%c0_231, %c0_232] : memref<8x8xf32, #tpu.memory_space<vmem>>, vector<8x8xf32>
    %cst_233 = arith.constant dense<0.000000e+00> : vector<8x256xf32>
    %383 = tpu.matmul %382, %381, %cst_233 {dimension_numbers = #tpu.dot_dimension_numbers<[1], [0], [0], [1], [0, 0, 1, 1], [], []>} : vector<8x8xf32>, vector<8x256xf32>, vector<8x256xf32> -> vector<8x256xf32>
    %c0_234 = arith.constant 0 : index
    %c0_235 = arith.constant 0 : index
    %384 = vector.load %arg19[%c0_234, %c0_235] : memref<8x1xf32, #tpu.memory_space<vmem>>, vector<8x1xf32>
    %385 = vector.broadcast %384 : vector<8x1xf32> to vector<8x256xf32>
    %386 = arith.addf %383, %385 : vector<8x256xf32>
    %cst_236 = arith.constant dense<0xFF800000> : vector<8xf32>
    %387 = vector.multi_reduction <maximumf>, %386, %cst_236 [1] : vector<8x256xf32> to vector<8xf32>
    %388 = vector.shape_cast %387 : vector<8xf32> to vector<8x1xf32>
    %389 = vector.shape_cast %388 : vector<8x1xf32> to vector<1x8x1xf32>
    %c0_237 = arith.constant 0 : index
    %c0_238 = arith.constant 0 : index
    %c0_239 = arith.constant 0 : index
    %390 = vector.load %arg20[%c0_237, %c0_238, %c0_239] : memref<1x8x1xf32, #tpu.memory_space<vmem>>, vector<1x8x1xf32>
    tpu.vector_store %arg20[%c0_237, %c0_238, %c0_239], %389 {strides = array<i32>} : memref<1x8x1xf32, #tpu.memory_space<vmem>>, vector<1x8x1xf32>,
    return
  }
  func.func @transform_0(%arg0: i32) -> (i32, i32, i32) {
    %c0_i32 = arith.constant 0 : i32
    %c0_i32_0 = arith.constant 0 : i32
    %c0_i32_1 = arith.constant 0 : i32
    return %arg0, %c0_i32, %c0_i32_0 : i32, i32, i32
  }
  func.func @transform_1(%arg0: i32) -> (i32, i32, i32) {
    %c0_i32 = arith.constant 0 : i32
    %c0_i32_0 = arith.constant 0 : i32
    %c0_i32_1 = arith.constant 0 : i32
    %c0_i32_2 = arith.constant 0 : i32
    return %c0_i32, %c0_i32_0, %c0_i32_1 : i32, i32, i32
  }
  func.func @transform_2(%arg0: i32) -> (i32, i32, i32) {
    %c0_i32 = arith.constant 0 : i32
    %c0_i32_0 = arith.constant 0 : i32
    %c0_i32_1 = arith.constant 0 : i32
    %c0_i32_2 = arith.constant 0 : i32
    return %c0_i32, %c0_i32_0, %c0_i32_1 : i32, i32, i32
  }
  func.func @transform_3(%arg0: i32) -> (i32, i32) {
    %c0_i32 = arith.constant 0 : i32
    %c0_i32_0 = arith.constant 0 : i32
    %c0_i32_1 = arith.constant 0 : i32
    return %c0_i32, %c0_i32_0 : i32, i32
  }
  func.func @transform_4(%arg0: i32) -> (i32, i32) {
    %c0_i32 = arith.constant 0 : i32
    %c0_i32_0 = arith.constant 0 : i32
    %c0_i32_1 = arith.constant 0 : i32
    return %c0_i32, %c0_i32_0 : i32, i32
  }
  func.func @transform_5(%arg0: i32) -> (i32, i32) {
    %c0_i32 = arith.constant 0 : i32
    %c0_i32_0 = arith.constant 0 : i32
    %c0_i32_1 = arith.constant 0 : i32
    return %c0_i32, %c0_i32_0 : i32, i32
  }
  func.func @transform_6(%arg0: i32) -> (i32, i32) {
    %c0_i32 = arith.constant 0 : i32
    %c0_i32_0 = arith.constant 0 : i32
    %c0_i32_1 = arith.constant 0 : i32
    return %c0_i32, %c0_i32_0 : i32, i32
  }
  func.func @transform_7(%arg0: i32) -> (i32, i32) {
    %c0_i32 = arith.constant 0 : i32
    %c0_i32_0 = arith.constant 0 : i32
    %c0_i32_1 = arith.constant 0 : i32
    return %c0_i32, %c0_i32_0 : i32, i32
  }
  func.func @transform_8(%arg0: i32) -> (i32, i32) {
    %c0_i32 = arith.constant 0 : i32
    %c0_i32_0 = arith.constant 0 : i32
    %c0_i32_1 = arith.constant 0 : i32
    return %c0_i32, %c0_i32_0 : i32, i32
  }
  func.func @transform_9(%arg0: i32) -> (i32, i32) {
    %c0_i32 = arith.constant 0 : i32
    %c0_i32_0 = arith.constant 0 : i32
    %c0_i32_1 = arith.constant 0 : i32
    return %c0_i32, %c0_i32_0 : i32, i32
  }
  func.func @transform_10(%arg0: i32) -> (i32, i32) {
    %c0_i32 = arith.constant 0 : i32
    %c0_i32_0 = arith.constant 0 : i32
    %c0_i32_1 = arith.constant 0 : i32
    return %c0_i32, %c0_i32_0 : i32, i32
  }
  func.func @transform_11(%arg0: i32) -> (i32, i32) {
    %c0_i32 = arith.constant 0 : i32
    %c0_i32_0 = arith.constant 0 : i32
    %c0_i32_1 = arith.constant 0 : i32
    return %c0_i32, %c0_i32_0 : i32, i32
  }
  func.func @transform_12(%arg0: i32) -> (i32, i32) {
    %c0_i32 = arith.constant 0 : i32
    %c0_i32_0 = arith.constant 0 : i32
    %c0_i32_1 = arith.constant 0 : i32
    return %c0_i32, %c0_i32_0 : i32, i32
  }
  func.func @transform_13(%arg0: i32) -> (i32, i32) {
    %c0_i32 = arith.constant 0 : i32
    %c0_i32_0 = arith.constant 0 : i32
    %c0_i32_1 = arith.constant 0 : i32
    return %c0_i32, %c0_i32_0 : i32, i32
  }
  func.func @transform_14(%arg0: i32) -> (i32, i32) {
    %c0_i32 = arith.constant 0 : i32
    %c0_i32_0 = arith.constant 0 : i32
    %c0_i32_1 = arith.constant 0 : i32
    return %c0_i32, %c0_i32_0 : i32, i32
  }
  func.func @transform_15(%arg0: i32) -> (i32, i32) {
    %c0_i32 = arith.constant 0 : i32
    %c0_i32_0 = arith.constant 0 : i32
    %c0_i32_1 = arith.constant 0 : i32
    return %c0_i32, %c0_i32_0 : i32, i32
  }
  func.func @transform_16(%arg0: i32) -> (i32, i32) {
    %c0_i32 = arith.constant 0 : i32
    %c0_i32_0 = arith.constant 0 : i32
    %c0_i32_1 = arith.constant 0 : i32
    return %c0_i32, %c0_i32_0 : i32, i32
  }
  func.func @transform_17(%arg0: i32) -> (i32, i32) {
    %c0_i32 = arith.constant 0 : i32
    %c0_i32_0 = arith.constant 0 : i32
    %c0_i32_1 = arith.constant 0 : i32
    return %c0_i32, %c0_i32_0 : i32, i32
  }
  func.func @transform_18(%arg0: i32) -> (i32, i32) {
    %c0_i32 = arith.constant 0 : i32
    %c0_i32_0 = arith.constant 0 : i32
    %c0_i32_1 = arith.constant 0 : i32
    return %c0_i32, %c0_i32_0 : i32, i32
  }
  func.func @transform_19(%arg0: i32) -> (i32, i32, i32) {
    %c0_i32 = arith.constant 0 : i32
    %c0_i32_0 = arith.constant 0 : i32
    %c0_i32_1 = arith.constant 0 : i32
    return %arg0, %c0_i32, %c0_i32_0 : i32, i32, i32
  }
}

</mosaic_0001>

<bundles_post_ra>
// kernel: hrnet_forward.1
= control target key start
LH: loop header
LB: loop body
LE: loop exit
PB: predicated region body
PF: predicated region fallthrough
CT: control target
= control target key end

     0   :  { %s3266_s0 = inlined_call_operand.vmem [shape: f32[2,8,256], index: 0, kind: input, shape index: {}]   ;;  %s3267_s1 = inlined_call_operand.vmem [shape: f32[9,1,256], index: 1, kind: input, shape index: {}]   ;;  %s3268_s2 = inlined_call_operand.vmem [shape: f32[9,1,256], index: 2, kind: input, shape index: {}]   ;;  %s3269_s3 = inlined_call_operand.vmem [shape: f32[256,256], index: 3, kind: input, shape index: {}]   ;;  %s3270_s4 = inlined_call_operand.vmem [shape: f32[8,256], index: 4, kind: input, shape index: {}]   ;;  %s3271_s5 = inlined_call_operand.vmem [shape: f32[8,72], index: 5, kind: input, shape index: {}]   ;;  %s3272_s6 = inlined_call_operand.vmem [shape: f32[8,1], index: 6, kind: input, shape index: {}]   ;;  %s3273_s7 = inlined_call_operand.vmem [shape: f32[8,72], index: 7, kind: input, shape index: {}]   ;;  %s3274_s8 = inlined_call_operand.vmem [shape: f32[8,1], index: 8, kind: input, shape index: {}]   ;;  %s3275_s9 = inlined_call_operand.vmem [shape: f32[8,8], index: 9, kind: input, shape index: {}]   ;;  %s3276_s10 = inlined_call_operand.vmem [shape: f32[8,1], index: 10, kind: input, shape index: {}]   ;;  %s3277_s11 = inlined_call_operand.vmem [shape: f32[8,72], index: 11, kind: input, shape index: {}]   ;;  %s3278_s12 = inlined_call_operand.vmem [shape: f32[8,72], index: 12, kind: input, shape index: {}]   ;;  %s3279_s13 = inlined_call_operand.vmem [shape: f32[8,72], index: 13, kind: input, shape index: {}]   ;;  %s3280_s14 = inlined_call_operand.vmem [shape: f32[8,1], index: 14, kind: input, shape index: {}]   ;;  %s3281_s15 = inlined_call_operand.vmem [shape: f32[8,72], index: 15, kind: input, shape index: {}]   ;;  %s3282_s16 = inlined_call_operand.vmem [shape: f32[8,1], index: 16, kind: input, shape index: {}]   ;;  %s3283_s17 = inlined_call_operand.vmem [shape: f32[8,8], index: 17, kind: input, shape index: {}]   ;;  %s3284_s18 = inlined_call_operand.vmem [shape: f32[8,1], index: 18, kind: input, shape index: {}]   ;;  %s3285_s19 = inlined_call_operand.vmem [shape: f32[2,8,1], index: 19, kind: output, shape index: {}]  }
   0x1   :  { %3307 = sst [smem:[#allocation2_spill]] %s3266_s0  ;;  %s2413_s0 = smov 0  }
   0x2   :  { %3308 = sst [smem:[#allocation3_spill]] %s3267_s1 }
   0x3   :  { %3309 = sst [smem:[#allocation4_spill]] %s3268_s2 }
   0x4   :  { %3310 = sst [smem:[#allocation5_spill]] %s3269_s3 }
   0x5 LB: > { %s2060_s30 = sadd.s32 4294967295, %s2293_s0   ;;  %p2064_p0 = scmp.ge.s32.totalorder %s2293_s0, 1  ;;  %s2293_s0 = sphi %s2413_s0, %s29_s0  }
   0x6   : > { %p537_p1 = scmp.lt.s32.totalorder %s2293_s0, 3 }
   0x8   : > { %p538_p2 = pnand %p2064_p0, %p537_p1 }
   0x9   : > { %p592_p3 = scmp.lt.s32.totalorder (!%p538_p2), %s2060_s30, 1  ;;  %s3311_s22 = sld [smem:[#allocation2_spill]] (!%p538_p2)  ;;  %v2301_v2 = vmov (!%p538_p2), 0.0   ;;  %v2302_v3 = vmov (!%p538_p2), 0   ;;  %v796_v4 = vld [vmem:[%s3272_s6] sm:$0xff] (!%p538_p2)  ;;  %v608_v5 = vlaneseq (!%p538_p2)  ;;  %vm802_vm8 = vcmask (!%p538_p2), 588800  }
   0xa   : > { %541 = sbr.rel (%p538_p2) target bundleno = 2793 (0xae9), region = 96  ;;  %s3301_s23 = smov (!%p538_p2), 16   ;;  %870 = vmatprep.mubr.f32.mxu0 (!%p538_p2), %v2301_v2  ;;  %1159 = vmatprep.mubr.f32.mxu1 (!%p538_p2), %v2301_v2 }
   0xb   : > { %s3303_s24 = smov (!%p538_p2), 17   ;;  %s3299_s25 = smov (!%p538_p2), 15   ;;  %2285 = vset.pattern.permute.xlu0 (!%p538_p2), %v2302_v3  ;;  %2286 = vset.pattern.permute.xlu1 (!%p538_p2), %v2302_v3  ;;  %v616_v6 = vshrl.u32 (!%p538_p2), %v608_v5, 7  ;;  %v2468_v7 = vand.u32 (!%p538_p2), 127, %v608_v5 }
   0xc   : > { %s3291_s3 = smov (!%p538_p2), 1   ;;  %s3297_s26 = smov (!%p538_p2), 127  }
   0xd   : > { %s3289_s27 = smov (!%p538_p2), 113   ;;  %s3295_s28 = smov (!%p538_p2), 112   ;;  %v2470_v8 = vsub.s32 (!%p538_p2), 0, %v616_v6  ;;  %v2472_v9 = vsub.s32 (!%p538_p2), 1, %v616_v6  ;;  %vm631_vm0 = vcmp.lt.s32.totalorder (!%p538_p2), %v2468_v7, 16  ;;  %vm610_vm1 = vcmp.lt.s32.totalorder (!%p538_p2), %v2468_v7, 17 }
   0xe   : > { %s3293_s29 = smov (!%p538_p2), 111   ;;  %vm653_vm2 = vcmp.lt.s32.totalorder (!%p538_p2), %v2468_v7, 15  ;;  %vm675_vm3 = vcmp.lt.s32.totalorder (!%p538_p2), %v2468_v7, 1  ;;  %vm712_vm4 = vcmp.lt.s32.totalorder (!%p538_p2), %v2468_v7, 127  ;;  %vm734_vm5 = vcmp.lt.s32.totalorder (!%p538_p2), %v2468_v7, 113  ;;  %s2305_s1 = smov (!%p538_p2), 34  }
   0xf   : > { %vm756_vm6 = vcmp.lt.s32.totalorder (!%p538_p2), %v2468_v7, 112  ;;  %vm778_vm7 = vcmp.lt.s32.totalorder (!%p538_p2), %v2468_v7, 111  ;;  %s2310_s21 = smov (!%p538_p2), 98   ;;  %vm900_vm9 = vcmp.lt.s32.totalorder (!%p538_p2), %v2468_v7, 34  ;;  %vm921_vm10 = vcmp.lt.s32.totalorder (!%p538_p2), %v2468_v7, 32 }
  0x10   : > { %vm943_vm11 = vcmp.lt.s32.totalorder (!%p538_p2), %v2468_v7, 30  ;;  %vm965_vm12 = vcmp.lt.s32.totalorder (!%p538_p2), %v2468_v7, 2  ;;  %vm1002_vm13 = vcmp.lt.s32.totalorder (!%p538_p2), %v2468_v7, 126  ;;  %vm1024_vm14 = vcmp.lt.s32.totalorder (!%p538_p2), %v2468_v7, 98 }
  0x11   : > { %s3324_s30 = smov (!%p592_p3, %s2060_s30), 1  ;;  %vm1046_vm15 = vcmp.lt.s32.totalorder %v2468_v7, 96 }
  0x12   : > { %s2094_s20 = sshll.u32 %s3324_s30, 4 }
  0x13   : > { %s596_s2 = scalar_lea.vmem %s3311_s22, %s2094_s20  ;;  %s2306_s22 = smov 32  }
  0x14   : > { %v2427_v0 = vld [vmem:[%s596_s2] sm:$0xff]  ;;  %v2433_v1 = vld [vmem:[%s596_s2 + $0x8] sm:$0xff]  ;;  %s3312_s2 = sld [smem:[#allocation3_spill]]  ;;  %s2309_s20 = smov 126  }
  0x15   : > { %627 = vrot.lane.b32.xlu1 %v2427_v0, %s3301_s23  ;;  %604 = vrot.lane.b32.xlu0 %v2427_v0, %s3303_s24 }
  0x19   : > { %629 = vrot.lane.b32.xlu1 %v2433_v1, %s3301_s23  ;;  %606 = vrot.lane.b32.xlu0 %v2433_v1, %s3303_s24  ;;  %s3317_s23 = smov 15   ;;  %s3318_s24 = smov 1  }
  0x1a   : > { %v2068_v10 = vld [vmem:[%s3312_s2 + $0x2] sm:$0x3]  ;;  %v613_v11 = vld [vmem:[%s3312_s2] sm:$0x3]  ;;  %v2069_v28 = vld [vmem:[%s3312_s2 + $0x4] sm:$0x3] }
  0x1b   : > { %v2483_v14 = vrot.slane %v2068_v10, %v2470_v8  ;;  %v2486_v15 = vrot.slane %v2068_v10, %v2472_v9  ;;  %v2489_v16 = vrot.slane %v613_v11, %v2470_v8  ;;  %v2492_v17 = vrot.slane %v613_v11, %v2472_v9  ;;  %v2070_v29 = vld [vmem:[%s3312_s2 + $0x6] sm:$0x3]  ;;  %v2071_v34 = vld [vmem:[%s3312_s2 + $0x8] sm:$0x3]  ;;  %v2072_v39 = vld [vmem:[%s3312_s2 + $0xa] sm:$0x3] }
  0x1c   : > { %v2522_v35 = vrot.slane %v2069_v28, %v2470_v8  ;;  %v2525_v36 = vrot.slane %v2069_v28, %v2472_v9  ;;  %v2529_v37 = vrot.slane %v2070_v29, %v2470_v8  ;;  %v2532_v38 = vrot.slane %v2070_v29, %v2472_v9  ;;  %v2073_v3 = vld [vmem:[%s3312_s2 + $0xc] sm:$0x3] }
  0x1d   : > { %651 = vrot.lane.b32.xlu1 %v2433_v1, %s3299_s25  ;;  %649 = vrot.lane.b32.xlu0 %v2427_v0, %s3299_s25  ;;  %v2544_v44 = vrot.slane %v2071_v34, %v2472_v9  ;;  %v2547_v45 = vrot.slane %v2071_v34, %v2470_v8  ;;  %v2554_v48 = vrot.slane %v2072_v39, %v2470_v8  ;;  %s3320_s25 = smov 113  }
  0x1e   : > { %v2557_v49 = vrot.slane %v2072_v39, %v2472_v9  ;;  %v2591_v10 = vrot.slane %v2073_v3, %v2470_v8  ;;  %v2594_v11 = vrot.slane %v2073_v3, %v2472_v9 }
  0x1f   : > { %v707_v58 = vmul.f32 %v2544_v44, %v2433_v1  ;;  %v706_v59 = vmul.f32 %v2547_v45, %v2427_v0 }
  0x21   : > { %673 = vrot.lane.b32.xlu1 %v2433_v1, %s3291_s3  ;;  %671 = vrot.lane.b32.xlu0 %v2427_v0, %s3291_s3  ;;  %s2307_s3 = smov 30  }
  0x25   : > { %710 = vrot.lane.b32.xlu1 %v2433_v1, %s3297_s26  ;;  %708 = vrot.lane.b32.xlu0 %v2427_v0, %s3297_s26 }
  0x29   : > { %732 = vrot.lane.b32.xlu1 %v2433_v1, %s3289_s27  ;;  %730 = vrot.lane.b32.xlu0 %v2427_v0, %s3289_s27  ;;  %s2308_s27 = smov 2  }
  0x2d   : > { %754 = vrot.lane.b32.xlu1 %v2433_v1, %s3295_s28  ;;  %752 = vrot.lane.b32.xlu0 %v2427_v0, %s3295_s28 }
  0x31   : > { %776 = vrot.lane.b32.xlu1 %v2433_v1, %s3293_s29  ;;  %774 = vrot.lane.b32.xlu0 %v2427_v0, %s3293_s29  ;;  %v2074_v0 = vld [vmem:[%s3312_s2 + $0xe] sm:$0x3] }
  0x35   : > { %799 = vperm.xlu0 %2285, %v796_v4  }
  0x87   : > { %v628_v12 = vpop.permute.xlu1 %627  ;;  %v605_v13 = vpop.permute.xlu0 %604 }
  0x8b   : > { %v630_v18 = vpop.permute.xlu1 %629  ;;  %v607_v19 = vpop.permute.xlu0 %606 }
  0x8c   : > { %v632_v20 = vsel %vm631_vm0, %v628_v12, %v630_v18  ;;  %v633_v21 = vsel %vm631_vm0, %v630_v18, %v628_v12  ;;  %v611_v22 = vsel %vm610_vm1, %v605_v13, %v607_v19  ;;  %v612_v23 = vsel %vm610_vm1, %v607_v19, %v605_v13  ;;  %v2075_v18 = vld [vmem:[%s3312_s2 + $0x10] sm:$0x3]  ;;  %s2067_s2 = sshll.u32 %s3324_s30, 3 }
  0x8d   : > { %v647_v24 = vmul.f32 %v2483_v14, %v633_v21  ;;  %v648_v25 = vmul.f32 %v2486_v15, %v632_v20  ;;  %v625_v26 = vmul.f32 %v2489_v16, %v612_v23  ;;  %v626_v27 = vmul.f32 %v2492_v17, %v611_v22  ;;  %s600_s29 = scalar_lea.vmem %s3285_s19, %s2067_s2 }
  0x8e   : > { %v2599_v12 = vrot.slane %v2074_v0, %v2470_v8  ;;  %v2602_v13 = vrot.slane %v2074_v0, %v2472_v9 }
  0x8f   : > { %v652_v30 = vpop.permute.xlu1 %651  ;;  %v650_v31 = vpop.permute.xlu0 %649  ;;  %v2513_v32 = vpack.c.bf16 %v648_v25, %v626_v27  ;;  %v2515_v33 = vpack.c.bf16 %v647_v24, %v625_v26  ;;  %v2618_v25 = vrot.slane %v2075_v18, %v2472_v9 }
  0x90   : > { %v654_v40 = vsel %vm653_vm2, %v650_v31, %v652_v30  ;;  %v655_v41 = vsel %vm653_vm2, %v652_v30, %v650_v31  ;;  %v2625_v30 = vrot.slane %v2075_v18, %v2470_v8 }
  0x91   : > { %2096 = vmatprep.subr.bf16.mxu0 %v2513_v32  ;;  %v669_v50 = vmul.f32 %v2522_v35, %v655_v41  ;;  %v670_v51 = vmul.f32 %v2525_v36, %v654_v40 }
  0x92   : > { %2098 = vmatpush1.bf16.msra.mxu0 %v2515_v33 }
  0x93   : > { %v674_v42 = vpop.permute.xlu1 %673  ;;  %v672_v43 = vpop.permute.xlu0 %671 }
  0x94   : > { %v676_v46 = vsel %vm675_vm3, %v672_v43, %v674_v42  ;;  %v677_v47 = vsel %vm675_vm3, %v674_v42, %v672_v43 }
  0x95   : > { %v691_v52 = vmul.f32 %v2529_v37, %v677_v47  ;;  %v692_v53 = vmul.f32 %v2532_v38, %v676_v46  ;;  %v603_v47 = vld [vmem:[%s3271_s5] sm:$0xff] }
  0x97   : > { %v711_v54 = vpop.permute.xlu1 %710  ;;  %v709_v55 = vpop.permute.xlu0 %708  ;;  %v2563_v56 = vpack.c.bf16 %v692_v53, %v670_v51  ;;  %v2565_v57 = vpack.c.bf16 %v691_v52, %v669_v50 }
  0x98   : > { %v713_v60 = vsel %vm712_vm4, %v709_v55, %v711_v54  ;;  %v714_v61 = vsel %vm712_vm4, %v711_v54, %v709_v55 }
  0x99   : > { %v728_v62 = vmul.f32 %v2554_v48, %v713_v60  ;;  %v729_v63 = vmul.f32 %v2557_v49, %v714_v61  ;;  %2100 = vmatprep.subr.bf16.mxu0 %v2563_v56 }
  0x9a   : > { %2102 = vmatpush1.bf16.msra.mxu0 %v2565_v57 }
  0x9b   : > { %v733_v1 = vpop.permute.xlu1 %732  ;;  %v731_v4 = vpop.permute.xlu0 %730  ;;  %v2586_v5 = vpack.c.bf16 %v729_v63, %v707_v58  ;;  %v2588_v6 = vpack.c.bf16 %v728_v62, %v706_v59 }
  0x9c   : > { %v735_v19 = vsel %vm734_vm5, %v731_v4, %v733_v1  ;;  %v736_v20 = vsel %vm734_vm5, %v733_v1, %v731_v4 }
  0x9d   : > { %2104 = vmatprep.subr.bf16.mxu0 %v2586_v5  ;;  %v750_v26 = vmul.f32 %v2591_v10, %v735_v19  ;;  %v751_v27 = vmul.f32 %v2594_v11, %v736_v20 }
  0x9e   : > { %2106 = vmatpush1.bf16.msra.mxu0 %v2588_v6 }
  0x9f   : > { %v755_v21 = vpop.permute.xlu1 %754  ;;  %v753_v22 = vpop.permute.xlu0 %752 }
  0xa0   : > { %v757_v23 = vsel %vm756_vm6, %v753_v22, %v755_v21  ;;  %v758_v24 = vsel %vm756_vm6, %v755_v21, %v753_v22  ;;  %v1086_v21 = vld [vmem:[%s3274_s8] sm:$0xff] }
  0xa1   : > { %v772_v28 = vmul.f32 %v2599_v12, %v757_v23  ;;  %v773_v29 = vmul.f32 %v2602_v13, %v758_v24 }
  0xa3   : > { %v777_v31 = vpop.permute.xlu1 %776  ;;  %v775_v34 = vpop.permute.xlu0 %774  ;;  %v2627_v39 = vpack.c.bf16 %v773_v29, %v751_v27  ;;  %v2629_v40 = vpack.c.bf16 %v772_v28, %v750_v26 }
  0xa4   : > { %v779_v41 = vsel %vm778_vm7, %v775_v34, %v777_v31  ;;  %v780_v42 = vsel %vm778_vm7, %v777_v31, %v775_v34 }
  0xa5   : > { %v2636_v43 = vmul.f32 %v2618_v25, %v780_v42  ;;  %2108 = vmatprep.subr.bf16.mxu0 %v2627_v39  ;;  %v2640_v46 = vmul.f32 %v2625_v30, %v779_v41 }
  0xa6   : > { %2110 = vmatpush1.bf16.msra.mxu0 %v2629_v40 }
  0xa7   : > { %822 = vmatprep.subr.mxu0 %v2636_v43 }
  0xaa   : > { %823 = vmatpush1.msra.mxu0 %v2640_v46 }
  0xab   : > { %2076 = vmatmul.mubr.msk.f32.vlgmr.msra.gmra.mrb[0].mxu0 %vm802_vm8, %v603_v47 }
  0xac   : > { %1538 = vmatprep.mubr.f32.mxu0 %v2301_v2 }
  0xb4   : > { %v800_v50 = vpop.permute.xlu0 %799 }
 0x17e   : > { %v872_v51 = vpop.f32.mrb[0].mxu0 }
 0x17f   : > { %v873_v52 = vadd.f32 %v872_v51, %v800_v50  ;;  %v874_v53 = vpop.f32.mrb[1].mxu0 }
 0x180   : > { %v875_v55 = vadd.f32 %v874_v53, %v800_v50 }
 0x181   : > { %v877_v54 = vmax.f32 %v873_v52, 0.0 }
 0x182   : > { %v878_v58 = vmax.f32 %v875_v55, 0.0 }
 0x183   : > { %879 = vrot.lane.b32.xlu1 %v877_v54, %s3297_s26 }
 0x187   : > { %881 = vrot.lane.b32.xlu1 %v878_v58, %s3297_s26  ;;  %s3321_s26 = smov 112  }
 0x1f5   : > { %v880_v59 = vpop.permute.xlu1 %879 }
 0x1f9   : > { %v882_v60 = vpop.permute.xlu1 %881 }
 0x1fa   : > { %v883_v61 = vsel %vm712_vm4, %v880_v59, %v882_v60  ;;  %v884_v62 = vsel %vm712_vm4, %v882_v60, %v880_v59 }
 0x1fb   : > { %v885_v63 = vmax.f32 %v877_v54, %v883_v61  ;;  %v886_v3 = vmax.f32 %v878_v58, %v884_v62 }
 0x1fd   : > { %889 = vrot.lane.b32.xlu1 %v886_v3, %s3295_s28  ;;  %887 = vrot.lane.b32.xlu0 %v885_v63, %s3295_s28 }
 0x26f   : > { %v890_v0 = vpop.permute.xlu1 %889  ;;  %v888_v1 = vpop.permute.xlu0 %887 }
 0x270   : > { %v891_v4 = vsel %vm756_vm6, %v888_v1, %v890_v0  ;;  %v892_v18 = vsel %vm756_vm6, %v890_v0, %v888_v1 }
 0x271   : > { %v2662_v19 = vmax.f32 %v885_v63, %v891_v4  ;;  %v2664_v20 = vmax.f32 %v886_v3, %v892_v18 }
 0x273   : > { %898 = vrot.lane.b32.xlu1 %v2664_v20, %s2305_s1  ;;  %896 = vrot.lane.b32.xlu0 %v2662_v19, %s2305_s1  ;;  %s2311_s1 = smov 96  }
 0x277   : > { %919 = vrot.lane.b32.xlu1 %v2664_v20, %s2306_s22  ;;  %917 = vrot.lane.b32.xlu0 %v2662_v19, %s2306_s22  ;;  %s2312_s22 = smov 94  }
 0x27b   : > { %941 = vrot.lane.b32.xlu1 %v2664_v20, %s2307_s3  ;;  %939 = vrot.lane.b32.xlu0 %v2662_v19, %s2307_s3  ;;  %s3314_s3 = sld [smem:[#allocation5_spill]] }
 0x27f   : > { %963 = vrot.lane.b32.xlu1 %v2664_v20, %s2308_s27  ;;  %961 = vrot.lane.b32.xlu0 %v2662_v19, %s2308_s27  ;;  %s3319_s27 = smov 127  }
 0x283   : > { %1000 = vrot.lane.b32.xlu1 %v2664_v20, %s2309_s20  ;;  %998 = vrot.lane.b32.xlu0 %v2662_v19, %s2309_s20 }
 0x287   : > { %1022 = vrot.lane.b32.xlu1 %v2664_v20, %s2310_s21  ;;  %1020 = vrot.lane.b32.xlu0 %v2662_v19, %s2310_s21  ;;  %s3313_s21 = sld [smem:[#allocation4_spill]] }
 0x28b   : > { %1044 = vrot.lane.b32.xlu1 %v2664_v20, %s2311_s1  ;;  %1042 = vrot.lane.b32.xlu0 %v2662_v19, %s2311_s1 }
 0x28d   : > { %v903_v22 = vld [vmem:[%s3313_s21] sm:$0x3]  ;;  %v2077_v23 = vld [vmem:[%s3313_s21 + $0x2] sm:$0x3]  ;;  %v2078_v54 = vld [vmem:[%s3313_s21 + $0x4] sm:$0x3] }
 0x28e   : > { %v908_v27 = vrot.slane %v903_v22, %v2470_v8  ;;  %v930_v28 = vrot.slane %v2077_v23, %v2470_v8  ;;  %v912_v29 = vrot.slane %v903_v22, %v2472_v9  ;;  %v934_v31 = vrot.slane %v2077_v23, %v2472_v9  ;;  %v2079_v59 = vld [vmem:[%s3313_s21 + $0x6] sm:$0x3]  ;;  %v2080_v0 = vld [vmem:[%s3313_s21 + $0x8] sm:$0x3] }
 0x28f   : > { %1066 = vrot.lane.b32.xlu1 %v2664_v20, %s2312_s22  ;;  %1064 = vrot.lane.b32.xlu0 %v2662_v19, %s2312_s22  ;;  %v952_v3 = vrot.slane %v2078_v54, %v2470_v8  ;;  %v956_v1 = vrot.slane %v2078_v54, %v2472_v9  ;;  %v974_v4 = vrot.slane %v2079_v59, %v2470_v8  ;;  %s3316_s22 = smov 16  }
 0x290   : > { %v978_v18 = vrot.slane %v2079_v59, %v2472_v9 }
 0x293   : > { %1089 = vperm.xlu0 %2285, %v1086_v21   ;;  %v2081_v21 = vld [vmem:[%s3313_s21 + $0xa] sm:$0x3] }
 0x2e5   : > { %v899_v24 = vpop.permute.xlu1 %898  ;;  %v897_v26 = vpop.permute.xlu0 %896 }
 0x2e6   : > { %v901_v34 = vsel %vm900_vm9, %v897_v26, %v899_v24  ;;  %v902_v41 = vsel %vm900_vm9, %v899_v24, %v897_v26  ;;  %vm1068_vm9 = vcmp.lt.s32.totalorder %v2468_v7, 94 }
 0x2e7   : > { %v915_v52 = vmul.f32 %v908_v27, %v902_v41  ;;  %v916_v55 = vmul.f32 %v912_v29, %v901_v34  ;;  %v993_v27 = vrot.slane %v2080_v0, %v2472_v9  ;;  %v1011_v34 = vrot.slane %v2081_v21, %v2470_v8 }
 0x2e8   : > { %v1015_v41 = vrot.slane %v2081_v21, %v2472_v9 }
 0x2e9   : > { %v920_v42 = vpop.permute.xlu1 %919  ;;  %v918_v47 = vpop.permute.xlu0 %917 }
 0x2ea   : > { %v922_v50 = vsel %vm921_vm10, %v918_v47, %v920_v42  ;;  %v923_v51 = vsel %vm921_vm10, %v920_v42, %v918_v47  ;;  %vm1191_vm10 = vcmask 64512  }
 0x2eb   : > { %v937_v53 = vmul.f32 %v930_v28, %v923_v51  ;;  %v938_v58 = vmul.f32 %v934_v31, %v922_v50  ;;  %v989_v28 = vrot.slane %v2080_v0, %v2470_v8  ;;  %v2083_v0 = vld [vmem:[%s3313_s21 + $0xe] sm:$0x3] }
 0x2ed   : > { %v942_v60 = vpop.permute.xlu1 %941  ;;  %v940_v61 = vpop.permute.xlu0 %939  ;;  %v2111_v62 = vpack.c.bf16 %v938_v58, %v916_v55  ;;  %v2113_v63 = vpack.c.bf16 %v937_v53, %v915_v52 }
 0x2ee   : > { %v944_v22 = vsel %vm943_vm11, %v940_v61, %v942_v60  ;;  %v945_v23 = vsel %vm943_vm11, %v942_v60, %v940_v61 }
 0x2ef   : > { %2112 = vmatprep.subr.bf16.mxu1 %v2111_v62  ;;  %v959_v42 = vmul.f32 %v952_v3, %v945_v23  ;;  %v960_v47 = vmul.f32 %v956_v1, %v944_v22  ;;  %v2082_v62 = vld [vmem:[%s3313_s21 + $0xc] sm:$0x3]  ;;  %v996_v3 = vmul.f32 %v989_v28, %v2662_v19  ;;  %v1055_v19 = vrot.slane %v2083_v0, %v2470_v8 }
 0x2f0   : > { %2114 = vmatpush1.bf16.msra.mxu1 %v2113_v63  ;;  %v997_v63 = vmul.f32 %v993_v27, %v2664_v20  ;;  %v1033_v22 = vrot.slane %v2082_v62, %v2470_v8  ;;  %v1037_v23 = vrot.slane %v2082_v62, %v2472_v9  ;;  %v1059_v20 = vrot.slane %v2083_v0, %v2472_v9 }
 0x2f1   : > { %v964_v24 = vpop.permute.xlu1 %963  ;;  %v962_v26 = vpop.permute.xlu0 %961 }
 0x2f2   : > { %v966_v29 = vsel %vm965_vm12, %v962_v26, %v964_v24  ;;  %v967_v31 = vsel %vm965_vm12, %v964_v24, %v962_v26  ;;  %v2084_v24 = vld [vmem:[%s3313_s21 + $0x10] sm:$0x3] }
 0x2f3   : > { %v981_v50 = vmul.f32 %v974_v4, %v967_v31  ;;  %v982_v51 = vmul.f32 %v978_v18, %v966_v29 }
 0x2f5   : > { %v1001_v52 = vpop.permute.xlu1 %1000  ;;  %v999_v53 = vpop.permute.xlu0 %998  ;;  %v2115_v54 = vpack.c.bf16 %v982_v51, %v960_v47  ;;  %v2117_v55 = vpack.c.bf16 %v981_v50, %v959_v42 }
 0x2f6   : > { %v1003_v58 = vsel %vm1002_vm13, %v999_v53, %v1001_v52  ;;  %v1004_v59 = vsel %vm1002_vm13, %v1001_v52, %v999_v53 }
 0x2f7   : > { %v1018_v60 = vmul.f32 %v1011_v34, %v1003_v58  ;;  %v1019_v61 = vmul.f32 %v1015_v41, %v1004_v59  ;;  %2116 = vmatprep.subr.bf16.mxu1 %v2115_v54  ;;  %v1081_v41 = vrot.slane %v2084_v24, %v2472_v9  ;;  %v1077_v58 = vrot.slane %v2084_v24, %v2470_v8  ;;  %v895_v9 = vld [vmem:[%s3273_s7] sm:$0xff] }
 0x2f8   : > { %2118 = vmatpush1.bf16.msra.mxu1 %v2117_v55 }
 0x2f9   : > { %v1023_v1 = vpop.permute.xlu1 %1022  ;;  %v1021_v4 = vpop.permute.xlu0 %1020  ;;  %v2119_v18 = vpack.c.bf16 %v1019_v61, %v997_v63  ;;  %v2121_v21 = vpack.c.bf16 %v1018_v60, %v996_v3 }
 0x2fa   : > { %v1025_v26 = vsel %vm1024_vm14, %v1021_v4, %v1023_v1  ;;  %v1026_v27 = vsel %vm1024_vm14, %v1023_v1, %v1021_v4 }
 0x2fb   : > { %2120 = vmatprep.subr.bf16.mxu1 %v2119_v18  ;;  %v1040_v42 = vmul.f32 %v1033_v22, %v1025_v26  ;;  %v1041_v47 = vmul.f32 %v1037_v23, %v1026_v27  ;;  %v1185_v26 = vld [vmem:[%s3276_s10] sm:$0xff]  ;;  %v1267_v27 = vld [vmem:[%s3314_s3 + $0x8] sm:$0xff] }
 0x2fc   : > { %2122 = vmatpush1.bf16.msra.mxu1 %v2121_v21 }
 0x2fd   : > { %v1045_v28 = vpop.permute.xlu1 %1044  ;;  %v1043_v29 = vpop.permute.xlu0 %1042 }
 0x2fe   : > { %v1047_v31 = vsel %vm1046_vm15, %v1043_v29, %v1045_v28  ;;  %v1048_v34 = vsel %vm1046_vm15, %v1045_v28, %v1043_v29  ;;  %v1269_v28 = vld [vmem:[%s3314_s3 + $0x18] sm:$0xff] }
 0x2ff   : > { %v1062_v50 = vmul.f32 %v1055_v19, %v1047_v31  ;;  %v1063_v51 = vmul.f32 %v1059_v20, %v1048_v34  ;;  %v1266_v34 = vld [vmem:[%s3314_s3] sm:$0xff] }
 0x301   : > { %v1067_v52 = vpop.permute.xlu1 %1066  ;;  %v1065_v53 = vpop.permute.xlu0 %1064  ;;  %v2123_v54 = vpack.c.bf16 %v1063_v51, %v1041_v47  ;;  %v2125_v55 = vpack.c.bf16 %v1062_v50, %v1040_v42  ;;  %v1271_v50 = vld [vmem:[%s3314_s3 + $0x28] sm:$0xff]  ;;  %v1273_v51 = vld [vmem:[%s3314_s3 + $0x38] sm:$0xff] }
 0x302   : > { %v1070_v59 = vsel %vm1068_vm9, %v1067_v52, %v1065_v53  ;;  %v1069_v60 = vsel %vm1068_vm9, %v1065_v53, %v1067_v52 }
 0x303   : > { %v1085_v61 = vmul.f32 %v1081_v41, %v1070_v59  ;;  %2124 = vmatprep.subr.bf16.mxu1 %v2123_v54  ;;  %v1084_v62 = vmul.f32 %v1077_v58, %v1069_v60  ;;  %v1268_v41 = vld [vmem:[%s3314_s3 + $0x10] sm:$0xff]  ;;  %v2127_v54 = vpack.c.bf16 %v1269_v28, %v1267_v27  ;;  %v2131_v59 = vpack.c.bf16 %v1273_v51, %v1271_v50  ;;  %v1270_v60 = vld [vmem:[%s3314_s3 + $0x20] sm:$0xff]  ;;  %v1291_v50 = vld [vmem:[%s3314_s3 + $0xc8] sm:$0xff] }
 0x304   : > { %2126 = vmatpush1.bf16.msra.mxu1 %v2125_v55  ;;  %v1184_v55 = vld [vmem:[%s3275_s9] sm:$0xff]  ;;  %v2129_v58 = vpack.c.bf16 %v1268_v41, %v1266_v34  ;;  %v1284_v28 = vld [vmem:[%s3314_s3 + $0x90] sm:$0xff]  ;;  %v1293_v51 = vld [vmem:[%s3314_s3 + $0xd8] sm:$0xff] }
 0x305   : > { %1111 = vmatprep.subr.mxu1 %v1085_v61  ;;  %v1272_v61 = vld [vmem:[%s3314_s3 + $0x30] sm:$0xff]  ;;  %v1282_v27 = vld [vmem:[%s3314_s3 + $0x80] sm:$0xff] }
 0x306   : > { %v2145_v34 = vpack.c.bf16 %v1284_v28, %v1282_v27 }
 0x308   : > { %1112 = vmatpush1.msra.mxu1 %v1084_v62  ;;  %v1275_v62 = vld [vmem:[%s3314_s3 + $0x48] sm:$0xff] }
 0x309   : > { %2085 = vmatmul.mubr.msk.f32.vlgmr.msra.gmra.mrb[0].mxu1 %vm802_vm8, %v895_v9  ;;  %v1277_v9 = vld [vmem:[%s3314_s3 + $0x58] sm:$0xff] }
 0x30a   : > { %1259 = vmatprep.mubr.f32.mxu1 %v2301_v2 }
 0x312   : > { %v1090_v63 = vpop.permute.xlu0 %1089 }
 0x3dc   : > { %v1161_v3 = vpop.f32.mrb[0].mxu1 }
 0x3dd   : > { %v1162_v0 = vadd.f32 %v1161_v3, %v1090_v63  ;;  %v1163_v8 = vpop.f32.mrb[1].mxu1  ;;  %v2135_v3 = vpack.c.bf16 %v1277_v9, %v1275_v62  ;;  %v1294_v62 = vld [vmem:[%s3314_s3 + $0xe0] sm:$0xff]  ;;  %v1296_v9 = vld [vmem:[%s3314_s3 + $0xf0] sm:$0xff] }
 0x3de   : > { %v1164_v1 = vadd.f32 %v1163_v8, %v1090_v63  ;;  %v2133_v63 = vpack.c.bf16 %v1272_v61, %v1270_v60  ;;  %v1276_v8 = vld [vmem:[%s3314_s3 + $0x50] sm:$0xff] }
 0x3df   : > { %v1166_v4 = vmax.f32 %v1162_v0, 0.0  ;;  %v1274_v0 = vld [vmem:[%s3314_s3 + $0x40] sm:$0xff] }
 0x3e0   : > { %v1167_v18 = vmax.f32 %v1164_v1, 0.0  ;;  %v1279_v1 = vld [vmem:[%s3314_s3 + $0x68] sm:$0xff] }
 0x3e1   : > { %1168 = vrot.lane.b32.xlu1 %v1166_v4, %s2309_s20 }
 0x3e2   : > { %1170 = vrot.lane.b32.xlu0 %v1167_v18, %s2309_s20  ;;  %s3315_s20 = smov 17  }
 0x453   : > { %v1169_v21 = vpop.permute.xlu1 %1168 }
 0x454   : > { %v1171_v22 = vpop.permute.xlu0 %1170 }
 0x455   : > { %v1172_v23 = vsel %vm1002_vm13, %v1169_v21, %v1171_v22  ;;  %v1173_v19 = vsel %vm1002_vm13, %v1171_v22, %v1169_v21  ;;  %v1278_v22 = vld [vmem:[%s3314_s3 + $0x60] sm:$0xff] }
 0x456   : > { %v1174_v20 = vmax.f32 %v1166_v4, %v1172_v23  ;;  %v1175_v24 = vmax.f32 %v1167_v18, %v1173_v19  ;;  %v1281_v4 = vld [vmem:[%s3314_s3 + $0x78] sm:$0xff]  ;;  %v2137_v18 = vpack.c.bf16 %v1276_v8, %v1274_v0  ;;  %v1280_v23 = vld [vmem:[%s3314_s3 + $0x70] sm:$0xff]  ;;  %v1283_v19 = vld [vmem:[%s3314_s3 + $0x88] sm:$0xff]  ;;  %v2157_v0 = vpack.c.bf16 %v1296_v9, %v1294_v62 }
 0x457   : > { %v2139_v21 = vpack.c.bf16 %v1281_v4, %v1279_v1  ;;  %v1298_v1 = vld [vmem:[%s3314_s3 + $0x100] sm:$0xff]  ;;  %v1300_v4 = vld [vmem:[%s3314_s3 + $0x110] sm:$0xff] }
 0x458   : > { %1178 = vrot.lane.b32.xlu0 %v1175_v24, %s2311_s1  ;;  %1176 = vrot.lane.b32.xlu1 %v1174_v20, %s2311_s1  ;;  %s3322_s1 = smov 111  }
 0x45c   : > { %1188 = vperm.xlu1 %2286, %v1185_v26  }
 0x4ca   : > { %v1179_v29 = vpop.permute.xlu0 %1178  ;;  %v1177_v31 = vpop.permute.xlu1 %1176 }
 0x4cb   : > { %v1180_v42 = vsel %vm1046_vm15, %v1177_v31, %v1179_v29  ;;  %v1181_v47 = vsel %vm1046_vm15, %v1179_v29, %v1177_v31  ;;  %v1287_v29 = vld [vmem:[%s3314_s3 + $0xa8] sm:$0xff]  ;;  %v1289_v31 = vld [vmem:[%s3314_s3 + $0xb8] sm:$0xff] }
 0x4cc   : > { %v1182_v52 = vmax.f32 %v1174_v20, %v1180_v42  ;;  %v1183_v53 = vmax.f32 %v1175_v24, %v1181_v47  ;;  %v1285_v20 = vld [vmem:[%s3314_s3 + $0x98] sm:$0xff]  ;;  %v2141_v24 = vpack.c.bf16 %v1280_v23, %v1278_v22  ;;  %v2147_v41 = vpack.c.bf16 %v1289_v31, %v1287_v29  ;;  %v1286_v42 = vld [vmem:[%s3314_s3 + $0xa0] sm:$0xff]  ;;  %v1288_v47 = vld [vmem:[%s3314_s3 + $0xb0] sm:$0xff] }
 0x4cd   : > { %v2143_v26 = vpack.c.bf16 %v1285_v20, %v1283_v19  ;;  %v2161_v22 = vpack.c.bf16 %v1300_v4, %v1298_v1  ;;  %v1302_v19 = vld [vmem:[%s3314_s3 + $0x120] sm:$0xff]  ;;  %v1304_v20 = vld [vmem:[%s3314_s3 + $0x130] sm:$0xff] }
 0x4ce   : > { %1195 = vmatprep.subr.mxu1 %v1183_v53  ;;  %v2151_v53 = vpack.c.bf16 %v1293_v51, %v1291_v50  ;;  %v2165_v27 = vpack.c.bf16 %v1304_v20, %v1302_v19  ;;  %v1306_v29 = vld [vmem:[%s3314_s3 + $0x140] sm:$0xff]  ;;  %v1308_v31 = vld [vmem:[%s3314_s3 + $0x150] sm:$0xff]  ;;  %v1329_v19 = vld [vmem:[%s3314_s3 + $0x1f8] sm:$0xff] }
 0x4cf   : > { %1196 = vmatpush1.msra.mxu1 %v1182_v52  ;;  %v2149_v52 = vpack.c.bf16 %v1288_v47, %v1286_v42  ;;  %v2169_v42 = vpack.c.bf16 %v1308_v31, %v1306_v29  ;;  %v1310_v50 = vld [vmem:[%s3314_s3 + $0x160] sm:$0xff]  ;;  %v1312_v51 = vld [vmem:[%s3314_s3 + $0x170] sm:$0xff] }
 0x4d0   : > { %2086 = vmatmul.mubr.msk.f32.vlgmr.msra.gmra.mrb[2].mxu1 %vm1191_vm10, %v1184_v55  ;;  %2128 = vmatprep.subr.bf16.mxu1 %v2127_v54  ;;  %v1290_v54 = vld [vmem:[%s3314_s3 + $0xc0] sm:$0xff]  ;;  %v1292_v55 = vld [vmem:[%s3314_s3 + $0xd0] sm:$0xff] }
 0x4d1   : > { %2130 = vmatpush1.bf16.msra.mxu1 %v2129_v58  ;;  %v1295_v58 = vld [vmem:[%s3314_s3 + $0xe8] sm:$0xff]  ;;  %v2153_v60 = vpack.c.bf16 %v1292_v55, %v1290_v54  ;;  %v2173_v54 = vpack.c.bf16 %v1312_v51, %v1310_v50  ;;  %v3008_v50 = vld [vmem:[%s3270_s4] sm:$0xff] }
 0x4d2   : > { %2132 = vmatprep.subr.bf16.mxu1 %v2131_v59  ;;  %v1297_v59 = vld [vmem:[%s3314_s3 + $0xf8] sm:$0xff]  ;;  %v3013_v51 = vld [vmem:[%s3270_s4 + $0x8] sm:$0xff] }
 0x4d3   : > { %v2155_v61 = vpack.c.bf16 %v1297_v59, %v1295_v58  ;;  %v1314_v58 = vld [vmem:[%s3314_s3 + $0x180] sm:$0xff]  ;;  %v1316_v59 = vld [vmem:[%s3314_s3 + $0x190] sm:$0xff] }
 0x4d4   : > { %v2177_v62 = vpack.c.bf16 %v1316_v59, %v1314_v58 }
 0x4d5   : > { %2134 = vmatpush1.bf16.msra.mxu1 %v2133_v63  ;;  %v1299_v63 = vld [vmem:[%s3314_s3 + $0x108] sm:$0xff] }
 0x4d6   : > { %2136 = vmatprep.subr.bf16.mxu1 %v2135_v3  ;;  %v1301_v3 = vld [vmem:[%s3314_s3 + $0x118] sm:$0xff] }
 0x4d7   : > { %v2159_v8 = vpack.c.bf16 %v1301_v3, %v1299_v63  ;;  %v1318_v63 = vld [vmem:[%s3314_s3 + $0x1a0] sm:$0xff]  ;;  %v1320_v3 = vld [vmem:[%s3314_s3 + $0x1b0] sm:$0xff] }
 0x4d8   : > { %v2181_v1 = vpack.c.bf16 %v1320_v3, %v1318_v63 }
 0x4d9   : > { %2138 = vmatpush1.bf16.msra.mxu1 %v2137_v18  ;;  %v1303_v18 = vld [vmem:[%s3314_s3 + $0x128] sm:$0xff] }
 0x4da   : > { %2140 = vmatprep.subr.bf16.mxu1 %v2139_v21  ;;  %v1305_v21 = vld [vmem:[%s3314_s3 + $0x138] sm:$0xff] }
 0x4db   : > { %v2163_v23 = vpack.c.bf16 %v1305_v21, %v1303_v18  ;;  %v1322_v18 = vld [vmem:[%s3314_s3 + $0x1c0] sm:$0xff]  ;;  %v1324_v21 = vld [vmem:[%s3314_s3 + $0x1d0] sm:$0xff] }
 0x4dd   : > { %2142 = vmatpush1.bf16.msra.mxu1 %v2141_v24  ;;  %v1307_v24 = vld [vmem:[%s3314_s3 + $0x148] sm:$0xff] }
 0x4de   : > { %2144 = vmatprep.subr.bf16.mxu1 %v2143_v26  ;;  %v1309_v26 = vld [vmem:[%s3314_s3 + $0x158] sm:$0xff] }
 0x4df   : > { %v2167_v28 = vpack.c.bf16 %v1309_v26, %v1307_v24  ;;  %v1326_v24 = vld [vmem:[%s3314_s3 + $0x1e0] sm:$0xff]  ;;  %v1328_v26 = vld [vmem:[%s3314_s3 + $0x1f0] sm:$0xff] }
 0x4e1   : > { %2146 = vmatpush1.bf16.msra.mxu1 %v2145_v34  ;;  %v1311_v34 = vld [vmem:[%s3314_s3 + $0x168] sm:$0xff] }
 0x4e2   : > { %2148 = vmatprep.subr.bf16.mxu1 %v2147_v41  ;;  %v1313_v41 = vld [vmem:[%s3314_s3 + $0x178] sm:$0xff] }
 0x4e3   : > { %v2171_v47 = vpack.c.bf16 %v1313_v41, %v1311_v34 }
 0x4e5   : > { %2150 = vmatpush1.bf16.msra.mxu1 %v2149_v52  ;;  %v1315_v52 = vld [vmem:[%s3314_s3 + $0x188] sm:$0xff] }
 0x4e6   : > { %2152 = vmatprep.subr.bf16.mxu1 %v2151_v53  ;;  %v1317_v53 = vld [vmem:[%s3314_s3 + $0x198] sm:$0xff] }
 0x4e7   : > { %v2175_v55 = vpack.c.bf16 %v1317_v53, %v1315_v52  ;;  %v1762_v52 = vld [vmem:[%s3280_s14] sm:$0xff] }
 0x4e9   : > { %2154 = vmatpush1.bf16.msra.mxu1 %v2153_v60  ;;  %v1319_v60 = vld [vmem:[%s3314_s3 + $0x1a8] sm:$0xff] }
 0x4ea   : > { %2156 = vmatprep.subr.bf16.mxu1 %v2155_v61  ;;  %v1321_v61 = vld [vmem:[%s3314_s3 + $0x1b8] sm:$0xff] }
 0x4eb   : > { %v2179_v9 = vpack.c.bf16 %v1321_v61, %v1319_v60 }
 0x4ed   : > { %2158 = vmatpush1.bf16.msra.mxu1 %v2157_v0  ;;  %v1323_v0 = vld [vmem:[%s3314_s3 + $0x1c8] sm:$0xff] }
 0x4ee   : > { %2160 = vmatprep.subr.bf16.mxu1 %v2159_v8  ;;  %v1325_v8 = vld [vmem:[%s3314_s3 + $0x1d8] sm:$0xff] }
 0x4ef   : > { %v2183_v4 = vpack.c.bf16 %v1325_v8, %v1323_v0 }
 0x4f1   : > { %2162 = vmatpush1.bf16.msra.mxu1 %v2161_v22  ;;  %v2185_v22 = vpack.c.bf16 %v1324_v21, %v1322_v18 }
 0x4f2   : > { %2164 = vmatprep.subr.bf16.mxu1 %v2163_v23  ;;  %v1327_v23 = vld [vmem:[%s3314_s3 + $0x1e8] sm:$0xff] }
 0x4f3   : > { %v2187_v20 = vpack.c.bf16 %v1329_v19, %v1327_v23 }
 0x4f5   : > { %2166 = vmatpush1.bf16.msra.mxu1 %v2165_v27  ;;  %v2189_v27 = vpack.c.bf16 %v1328_v26, %v1326_v24 }
 0x4f6   : > { %2168 = vmatprep.subr.bf16.mxu1 %v2167_v28  ;;  %v1189_v28 = vpop.permute.xlu1 %1188 }
 0x4f9   : > { %2170 = vmatpush1.bf16.msra.mxu1 %v2169_v42 }
 0x4fa   : > { %2172 = vmatprep.subr.bf16.mxu1 %v2171_v47 }
 0x4fd   : > { %2174 = vmatpush1.bf16.msra.mxu1 %v2173_v54 }
 0x4fe   : > { %2176 = vmatprep.subr.bf16.mxu1 %v2175_v55 }
 0x501   : > { %2178 = vmatpush1.bf16.msra.mxu1 %v2177_v62 }
 0x502   : > { %2180 = vmatprep.subr.bf16.mxu1 %v2179_v9 }
 0x505   : > { %2182 = vmatpush1.bf16.msra.mxu1 %v2181_v1 }
 0x506   : > { %2184 = vmatprep.subr.bf16.mxu1 %v2183_v4 }
 0x509   : > { %2186 = vmatpush1.bf16.msra.mxu1 %v2185_v22 }
 0x50a   : > { %2188 = vmatprep.subr.bf16.mxu1 %v2187_v20 }
 0x50d   : > { %2190 = vmatpush1.bf16.msra.mxu1 %v2189_v27 }
 0x5a3   : > { %v1261_v29 = vpop.f32.mrb[2].mxu1 }
 0x5a4   : > { %v1263_v31 = vpop.f32.mrb[3].mxu1  ;;  %v1262_v41 = vadd.f32 %v1261_v29, %v1189_v28 }
 0x5a5   : > { %v1264_v34 = vadd.f32 %v1263_v31, %v1189_v28 }
 0x5a7   : > { %1394 = vmatprep.mubr.f32.mxu1 %v1264_v34 }
 0x5a8   : > { %1395 = vmatmul.mubr.f32.vlgmr.msra.gmra.mrb[4].mxu1 %v1262_v41 }
 0x5a9   : > { %1995 = vmatprep.mubr.f32.mxu1 %v2301_v2 }
 0x67b   : > { %v2969_v42 = vpop.f32.mrb[4].mxu1 }
 0x67c   : > { %1405 = vrot.lane.b32.xlu0 %v2969_v42, %s3315_s20  ;;  %v2973_v47 = vpop.f32.mrb[5].mxu1 }
 0x67d   : > { %1407 = vrot.lane.b32.xlu1 %v2973_v47, %s3315_s20 }
 0x680   : > { %1413 = vrot.lane.b32.xlu0 %v2969_v42, %s3316_s22 }
 0x681   : > { %1415 = vrot.lane.b32.xlu1 %v2973_v47, %s3316_s22 }
 0x684   : > { %1421 = vrot.lane.b32.xlu0 %v2969_v42, %s3317_s23 }
 0x685   : > { %1423 = vrot.lane.b32.xlu1 %v2973_v47, %s3317_s23 }
 0x688   : > { %1429 = vrot.lane.b32.xlu0 %v2969_v42, %s3318_s24 }
 0x689   : > { %1431 = vrot.lane.b32.xlu1 %v2973_v47, %s3318_s24 }
 0x68c   : > { %1439 = vrot.lane.b32.xlu0 %v2969_v42, %s3319_s27 }
 0x68d   : > { %1441 = vrot.lane.b32.xlu1 %v2973_v47, %s3319_s27 }
 0x690   : > { %1447 = vrot.lane.b32.xlu0 %v2969_v42, %s3320_s25 }
 0x691   : > { %1449 = vrot.lane.b32.xlu1 %v2973_v47, %s3320_s25 }
 0x694   : > { %1455 = vrot.lane.b32.xlu0 %v2969_v42, %s3321_s26 }
 0x695   : > { %1457 = vrot.lane.b32.xlu1 %v2973_v47, %s3321_s26 }
 0x698   : > { %1463 = vrot.lane.b32.xlu0 %v2969_v42, %s3322_s1 }
 0x699   : > { %1465 = vrot.lane.b32.xlu1 %v2973_v47, %s3322_s1 }
 0x69c   : > { %1620 = vrot.lane.b32.xlu0 %v3008_v50, %s3315_s20 }
 0x69d   : > { %1622 = vrot.lane.b32.xlu1 %v3013_v51, %s3315_s20 }
 0x6a0   : > { %1628 = vrot.lane.b32.xlu0 %v3008_v50, %s3316_s22 }
 0x6a1   : > { %1630 = vrot.lane.b32.xlu1 %v3013_v51, %s3316_s22 }
 0x6a4   : > { %1636 = vrot.lane.b32.xlu0 %v3008_v50, %s3317_s23 }
 0x6a5   : > { %1638 = vrot.lane.b32.xlu1 %v3013_v51, %s3317_s23 }
 0x6a8   : > { %1644 = vrot.lane.b32.xlu0 %v3008_v50, %s3318_s24 }
 0x6a9   : > { %1646 = vrot.lane.b32.xlu1 %v3013_v51, %s3318_s24 }
 0x6ac   : > { %1654 = vrot.lane.b32.xlu0 %v3008_v50, %s3319_s27 }
 0x6ad   : > { %1656 = vrot.lane.b32.xlu1 %v3013_v51, %s3319_s27 }
 0x6b0   : > { %1662 = vrot.lane.b32.xlu0 %v3008_v50, %s3320_s25 }
 0x6b1   : > { %1664 = vrot.lane.b32.xlu1 %v3013_v51, %s3320_s25 }
 0x6b4   : > { %1670 = vrot.lane.b32.xlu0 %v3008_v50, %s3321_s26 }
 0x6b5   : > { %1672 = vrot.lane.b32.xlu1 %v3013_v51, %s3321_s26 }
 0x6b8   : > { %1678 = vrot.lane.b32.xlu0 %v3008_v50, %s3322_s1 }
 0x6b9   : > { %1680 = vrot.lane.b32.xlu1 %v3013_v51, %s3322_s1 }
 0x6bc   : > { %1765 = vperm.xlu0 %2285, %v1762_v52  }
 0x6ee   : > { %v1406_v53 = vpop.permute.xlu0 %1405 }
 0x6ef   : > { %v1408_v54 = vpop.permute.xlu1 %1407 }
 0x6f0   : > { %v1409_v55 = vsel %vm610_vm1, %v1406_v53, %v1408_v54  ;;  %v1410_v58 = vsel %vm610_vm1, %v1408_v54, %v1406_v53 }
 0x6f1   : > { %v1411_v9 = vmul.f32 %v1410_v58, %v2489_v16  ;;  %v1412_v63 = vmul.f32 %v1409_v55, %v2492_v17  ;;  %v1437_v55 = vmul.f32 %v2969_v42, %v2547_v45 }
 0x6f2   : > { %v1414_v59 = vpop.permute.xlu0 %1413 }
 0x6f3   : > { %v1416_v60 = vpop.permute.xlu1 %1415 }
 0x6f4   : > { %v1417_v61 = vsel %vm631_vm0, %v1414_v59, %v1416_v60  ;;  %v1418_v62 = vsel %vm631_vm0, %v1416_v60, %v1414_v59  ;;  %v1438_v60 = vmul.f32 %v2973_v47, %v2544_v44 }
 0x6f5   : > { %v1419_v3 = vmul.f32 %v1418_v62, %v2483_v14  ;;  %v1420_v0 = vmul.f32 %v1417_v61, %v2486_v15 }
 0x6f6   : > { %v1422_v8 = vpop.permute.xlu0 %1421 }
 0x6f7   : > { %v2193_v1 = vpack.c.bf16 %v1419_v3, %v1411_v9  ;;  %v1424_v4 = vpop.permute.xlu1 %1423  ;;  %v2191_v18 = vpack.c.bf16 %v1420_v0, %v1412_v63 }
 0x6f8   : > { %v1425_v21 = vsel %vm653_vm2, %v1422_v8, %v1424_v4  ;;  %v1426_v22 = vsel %vm653_vm2, %v1424_v4, %v1422_v8 }
 0x6f9   : > { %2192 = vmatprep.subr.bf16.mxu0 %v2191_v18  ;;  %v1427_v26 = vmul.f32 %v1426_v22, %v2522_v35  ;;  %v1428_v27 = vmul.f32 %v1425_v21, %v2525_v36 }
 0x6fa   : > { %v1430_v23 = vpop.permute.xlu0 %1429  ;;  %2194 = vmatpush1.bf16.msra.mxu0 %v2193_v1 }
 0x6fb   : > { %v1432_v19 = vpop.permute.xlu1 %1431 }
 0x6fc   : > { %v1433_v20 = vsel %vm675_vm3, %v1430_v23, %v1432_v19  ;;  %v1434_v24 = vsel %vm675_vm3, %v1432_v19, %v1430_v23 }
 0x6fd   : > { %v1435_v28 = vmul.f32 %v1434_v24, %v2529_v37  ;;  %v1436_v29 = vmul.f32 %v1433_v20, %v2532_v38 }
 0x6fe   : > { %v1440_v31 = vpop.permute.xlu0 %1439 }
 0x6ff   : > { %v2197_v34 = vpack.c.bf16 %v1435_v28, %v1427_v26  ;;  %v1442_v41 = vpop.permute.xlu1 %1441  ;;  %v2195_v52 = vpack.c.bf16 %v1436_v29, %v1428_v27 }
 0x700   : > { %v1443_v53 = vsel %vm712_vm4, %v1440_v31, %v1442_v41  ;;  %v1444_v54 = vsel %vm712_vm4, %v1442_v41, %v1440_v31  ;;  %v1404_v41 = vld [vmem:[%s3278_s12] sm:$0xff] }
 0x701   : > { %v1445_v58 = vmul.f32 %v1443_v53, %v2554_v48  ;;  %v1446_v59 = vmul.f32 %v1444_v54, %v2557_v49  ;;  %2196 = vmatprep.subr.bf16.mxu0 %v2195_v52 }
 0x702   : > { %v1448_v61 = vpop.permute.xlu0 %1447  ;;  %2198 = vmatpush1.bf16.msra.mxu0 %v2197_v34 }
 0x703   : > { %v2201_v62 = vpack.c.bf16 %v1445_v58, %v1437_v55  ;;  %v1450_v9 = vpop.permute.xlu1 %1449  ;;  %v2199_v63 = vpack.c.bf16 %v1446_v59, %v1438_v60 }
 0x704   : > { %v1451_v3 = vsel %vm734_vm5, %v1448_v61, %v1450_v9  ;;  %v1452_v42 = vsel %vm734_vm5, %v1450_v9, %v1448_v61 }
 0x705   : > { %2200 = vmatprep.subr.bf16.mxu0 %v2199_v63  ;;  %v1453_v4 = vmul.f32 %v1451_v3, %v2591_v10  ;;  %v1454_v18 = vmul.f32 %v1452_v42, %v2594_v11 }
 0x706   : > { %v1456_v0 = vpop.permute.xlu0 %1455  ;;  %2202 = vmatpush1.bf16.msra.mxu0 %v2201_v62 }
 0x707   : > { %v1458_v8 = vpop.permute.xlu1 %1457 }
 0x708   : > { %v1459_v1 = vsel %vm756_vm6, %v1456_v0, %v1458_v8  ;;  %v1460_v47 = vsel %vm756_vm6, %v1458_v8, %v1456_v0 }
 0x709   : > { %v1461_v21 = vmul.f32 %v1459_v1, %v2599_v12  ;;  %v1462_v22 = vmul.f32 %v1460_v47, %v2602_v13 }
 0x70a   : > { %v1464_v23 = vpop.permute.xlu0 %1463 }
 0x70b   : > { %v2205_v19 = vpack.c.bf16 %v1461_v21, %v1453_v4  ;;  %v1466_v20 = vpop.permute.xlu1 %1465  ;;  %v2203_v24 = vpack.c.bf16 %v1462_v22, %v1454_v18  ;;  %v1403_v4 = vld [vmem:[%s3277_s11] sm:$0xff] }
 0x70c   : > { %v1468_v26 = vsel %vm778_vm7, %v1466_v20, %v1464_v23  ;;  %v1467_v27 = vsel %vm778_vm7, %v1464_v23, %v1466_v20 }
 0x70d   : > { %v1470_v28 = vmul.f32 %v1468_v26, %v2618_v25  ;;  %2204 = vmatprep.subr.bf16.mxu0 %v2203_v24  ;;  %v1469_v34 = vmul.f32 %v1467_v27, %v2625_v30  ;;  %v1652_v27 = vmul.f32 %v3008_v50, %v2547_v45 }
 0x70e   : > { %2206 = vmatpush1.bf16.msra.mxu0 %v2205_v19  ;;  %v1621_v29 = vpop.permute.xlu0 %1620 }
 0x70f   : > { %v1623_v31 = vpop.permute.xlu1 %1622  ;;  %1490 = vmatprep.subr.mxu0 %v1470_v28 }
 0x710   : > { %v1624_v60 = vsel %vm610_vm1, %v1621_v29, %v1623_v31 }
 0x711   : > { %v1627_v62 = vmul.f32 %v1624_v60, %v2492_v17 }
 0x712   : > { %1491 = vmatpush1.msra.mxu0 %v1469_v34  ;;  %v1629_v52 = vpop.permute.xlu0 %1628 }
 0x713   : > { %v1631_v53 = vpop.permute.xlu1 %1630  ;;  %2208 = vmatprep.subr.bf16.mxu0 %v2513_v32  ;;  %2087 = vmatmul.mubr.msk.f32.vlgmr.msra.gmra.mrb[2].mxu0 %vm802_vm8, %v1404_v41 }
 0x714   : > { %2210 = vmatpush1.bf16.msra.mxu0 %v2515_v33  ;;  %1612 = vmatprep.mubr.f32.mxu0 %v2301_v2  ;;  %v1632_v32 = vsel %vm631_vm0, %v1629_v52, %v1631_v53  ;;  %v1625_v33 = vsel %vm610_vm1, %v1623_v31, %v1621_v29 }
 0x715   : > { %2212 = vmatprep.subr.bf16.mxu0 %v2563_v56  ;;  %v1633_v56 = vsel %vm631_vm0, %v1631_v53, %v1629_v52  ;;  %v1635_v9 = vmul.f32 %v1632_v32, %v2486_v15  ;;  %v1626_v63 = vmul.f32 %v1625_v33, %v2489_v16 }
 0x716   : > { %v1637_v54 = vpop.permute.xlu0 %1636  ;;  %v1634_v3 = vmul.f32 %v1633_v56, %v2483_v14 }
 0x717   : > { %v1639_v55 = vpop.permute.xlu1 %1638  ;;  %v2223_v21 = vpack.c.bf16 %v1635_v9, %v1627_v62  ;;  %v1619_v62 = vld [vmem:[%s3279_s13] sm:$0xff] }
 0x718   : > { %2214 = vmatpush1.bf16.msra.mxu0 %v2565_v57  ;;  %v1640_v57 = vsel %vm653_vm2, %v1637_v54, %v1639_v55  ;;  %v1641_v42 = vsel %vm653_vm2, %v1639_v55, %v1637_v54  ;;  %v2225_v22 = vpack.c.bf16 %v1634_v3, %v1626_v63 }
 0x719   : > { %2216 = vmatprep.subr.bf16.mxu0 %v2586_v5  ;;  %v1642_v23 = vmul.f32 %v1641_v42, %v2522_v35 }
 0x71a   : > { %v1645_v58 = vpop.permute.xlu0 %1644 }
 0x71b   : > { %v1647_v59 = vpop.permute.xlu1 %1646 }
 0x71c   : > { %2218 = vmatpush1.bf16.msra.mxu0 %v2588_v6  ;;  %v1648_v5 = vsel %vm675_vm3, %v1645_v58, %v1647_v59  ;;  %v1649_v0 = vsel %vm675_vm3, %v1647_v59, %v1645_v58 }
 0x71d   : > { %2220 = vmatprep.subr.bf16.mxu0 %v2627_v39  ;;  %v1643_v39 = vmul.f32 %v1640_v57, %v2525_v36  ;;  %v1651_v8 = vmul.f32 %v1648_v5, %v2532_v38  ;;  %v1650_v19 = vmul.f32 %v1649_v0, %v2529_v37 }
 0x71e   : > { %v1655_v61 = vpop.permute.xlu0 %1654 }
 0x71f   : > { %v1657_v6 = vpop.permute.xlu1 %1656  ;;  %v2227_v24 = vpack.c.bf16 %v1651_v8, %v1643_v39  ;;  %v1922_v8 = vld [vmem:[%s3284_s18] sm:$0xff] }
 0x720   : > { %2222 = vmatpush1.bf16.msra.mxu0 %v2629_v40  ;;  %v1659_v1 = vsel %vm712_vm4, %v1657_v6, %v1655_v61  ;;  %v1653_v40 = vmul.f32 %v3013_v51, %v2544_v44 }
 0x721   : > { %1564 = vmatprep.subr.mxu0 %v2636_v43  ;;  %v1661_v20 = vmul.f32 %v1659_v1, %v2557_v49  ;;  %v1658_v43 = vsel %vm712_vm4, %v1655_v61, %v1657_v6 }
 0x722   : > { %v1663_v47 = vpop.permute.xlu0 %1662  ;;  %v1660_v29 = vmul.f32 %v1658_v43, %v2554_v48 }
 0x723   : > { %v1665_v18 = vpop.permute.xlu1 %1664  ;;  %v2231_v34 = vpack.c.bf16 %v1661_v20, %v1653_v40 }
 0x724   : > { %1565 = vmatpush1.msra.mxu0 %v2640_v46  ;;  %v1667_v26 = vsel %vm734_vm5, %v1665_v18, %v1663_v47  ;;  %v2229_v46 = vpack.c.bf16 %v1650_v19, %v1642_v23  ;;  %v1666_v41 = vsel %vm734_vm5, %v1663_v47, %v1665_v18  ;;  %v2233_v58 = vpack.c.bf16 %v1660_v29, %v1652_v27 }
 0x725   : > { %2224 = vmatprep.subr.bf16.mxu0 %v2223_v21  ;;  %2088 = vmatmul.mubr.msk.f32.vlgmr.msra.gmra.mrb[2].mxu0 %vm802_vm8, %v1403_v4  ;;  %v1669_v52 = vmul.f32 %v1667_v26, %v2594_v11  ;;  %v1668_v59 = vmul.f32 %v1666_v41, %v2591_v10 }
 0x726   : > { %2226 = vmatpush1.bf16.msra.mxu0 %v2225_v22  ;;  %v1671_v51 = vpop.permute.xlu0 %1670  ;;  %1753 = vmatprep.mubr.f32.mxu0 %v2301_v2 }
 0x727   : > { %v1673_v28 = vpop.permute.xlu1 %1672  ;;  %2228 = vmatprep.subr.bf16.mxu0 %v2227_v24 }
 0x728   : > { %v1675_v31 = vsel %vm756_vm6, %v1673_v28, %v1671_v51  ;;  %v1674_v53 = vsel %vm756_vm6, %v1671_v51, %v1673_v28 }
 0x729   : > { %v1677_v54 = vmul.f32 %v1675_v31, %v2602_v13  ;;  %v1676_v60 = vmul.f32 %v1674_v53, %v2599_v12 }
 0x72a   : > { %2230 = vmatpush1.bf16.msra.mxu0 %v2229_v46  ;;  %v1679_v50 = vpop.permute.xlu0 %1678 }
 0x72b   : > { %2232 = vmatprep.subr.bf16.mxu0 %v2231_v34  ;;  %v1681_v55 = vpop.permute.xlu1 %1680  ;;  %v2235_v33 = vpack.c.bf16 %v1677_v54, %v1669_v52  ;;  %v2237_v5 = vpack.c.bf16 %v1676_v60, %v1668_v59 }
 0x72c   : > { %v1683_v32 = vsel %vm778_vm7, %v1681_v55, %v1679_v50  ;;  %v1682_v56 = vsel %vm778_vm7, %v1679_v50, %v1681_v55 }
 0x72d   : > { %v1685_v57 = vmul.f32 %v1683_v32, %v2618_v25  ;;  %v1684_v61 = vmul.f32 %v1682_v56, %v2625_v30 }
 0x72e   : > { %2234 = vmatpush1.bf16.msra.mxu0 %v2233_v58 }
 0x72f   : > { %2236 = vmatprep.subr.bf16.mxu0 %v2235_v33 }
 0x732   : > { %2238 = vmatpush1.bf16.msra.mxu0 %v2237_v5 }
 0x733   : > { %1705 = vmatprep.subr.mxu0 %v1685_v57 }
 0x736   : > { %1706 = vmatpush1.msra.mxu0 %v1684_v61 }
 0x737   : > { %2089 = vmatmul.mubr.msk.f32.vlgmr.msra.gmra.mrb[2].mxu0 %vm802_vm8, %v1619_v62 }
 0x738   : > { %1912 = vmatprep.mubr.f32.mxu0 %v2301_v2  ;;  %v1839_v2 = vld [vmem:[%s3282_s16] sm:$0xff] }
 0x73b   : > { %v1766_v9 = vpop.permute.xlu0 %1765 }
 0x80a   : > { %v1755_v6 = vpop.f32.mrb[2].mxu0 }
 0x80b   : > { %v1768_v63 = vadd.f32 %v1766_v9, %v1755_v6  ;;  %v1757_v3 = vpop.f32.mrb[3].mxu0 }
 0x80c   : > { %v1769_v42 = vadd.f32 %v1766_v9, %v1757_v3 }
 0x80d   : > { %v1770_v39 = vmax.f32 %v1768_v63, 0.0 }
 0x80e   : > { %v1771_v0 = vmax.f32 %v1769_v42, 0.0 }
 0x80f   : > { %1773 = vrot.lane.b32.xlu1 %v1770_v39, %s3315_s20  ;;  %v1805_v60 = vmul.f32 %v1770_v39, %v2547_v45 }
 0x810   : > { %1775 = vrot.lane.b32.xlu0 %v1771_v0, %s3315_s20 }
 0x813   : > { %1781 = vrot.lane.b32.xlu1 %v1770_v39, %s3316_s22 }
 0x814   : > { %1783 = vrot.lane.b32.xlu0 %v1771_v0, %s3316_s22 }
 0x817   : > { %1789 = vrot.lane.b32.xlu1 %v1770_v39, %s3317_s23 }
 0x818   : > { %1791 = vrot.lane.b32.xlu0 %v1771_v0, %s3317_s23 }
 0x81b   : > { %1797 = vrot.lane.b32.xlu1 %v1770_v39, %s3318_s24 }
 0x81c   : > { %1799 = vrot.lane.b32.xlu0 %v1771_v0, %s3318_s24 }
 0x81f   : > { %1807 = vrot.lane.b32.xlu1 %v1770_v39, %s3319_s27 }
 0x820   : > { %1809 = vrot.lane.b32.xlu0 %v1771_v0, %s3319_s27 }
 0x823   : > { %1815 = vrot.lane.b32.xlu1 %v1770_v39, %s3320_s25 }
 0x824   : > { %1817 = vrot.lane.b32.xlu0 %v1771_v0, %s3320_s25 }
 0x827   : > { %1823 = vrot.lane.b32.xlu1 %v1770_v39, %s3321_s26 }
 0x828   : > { %1825 = vrot.lane.b32.xlu0 %v1771_v0, %s3321_s26 }
 0x82b   : > { %1831 = vrot.lane.b32.xlu1 %v1770_v39, %s3322_s1 }
 0x82c   : > { %1833 = vrot.lane.b32.xlu0 %v1771_v0, %s3322_s1 }
 0x82f   : > { %1842 = vperm.xlu1 %2286, %v1839_v2  }
 0x830   : > { %1925 = vperm.xlu0 %2285, %v1922_v8  }
 0x881   : > { %v1774_v1 = vpop.permute.xlu1 %1773 }
 0x882   : > { %v1776_v47 = vpop.permute.xlu0 %1775 }
 0x883   : > { %v1777_v4 = vsel %vm610_vm1, %v1774_v1, %v1776_v47  ;;  %v1778_v18 = vsel %vm610_vm1, %v1776_v47, %v1774_v1 }
 0x884   : > { %v1779_v19 = vmul.f32 %v1778_v18, %v2489_v16  ;;  %v1780_v20 = vmul.f32 %v1777_v4, %v2492_v17  ;;  %v1921_v18 = vld [vmem:[%s3283_s17] sm:$0xff] }
 0x885   : > { %v1782_v21 = vpop.permute.xlu1 %1781 }
 0x886   : > { %v1784_v40 = vpop.permute.xlu0 %1783 }
 0x887   : > { %v1785_v22 = vsel %vm631_vm0, %v1782_v21, %v1784_v40  ;;  %v1786_v23 = vsel %vm631_vm0, %v1784_v40, %v1782_v21  ;;  %vm2005_vm0 = vcmask 7168  }
 0x888   : > { %v1787_v43 = vmul.f32 %v1786_v23, %v2483_v14  ;;  %v1788_v24 = vmul.f32 %v1785_v22, %v2486_v15 }
 0x889   : > { %v1790_v26 = vpop.permute.xlu1 %1789 }
 0x88a   : > { %v2241_v51 = vpack.c.bf16 %v1787_v43, %v1779_v19  ;;  %v1792_v27 = vpop.permute.xlu0 %1791  ;;  %v2239_v28 = vpack.c.bf16 %v1788_v24, %v1780_v20 }
 0x88b   : > { %v1793_v46 = vsel %vm653_vm2, %v1790_v26, %v1792_v27  ;;  %v1794_v29 = vsel %vm653_vm2, %v1792_v27, %v1790_v26 }
 0x88c   : > { %2240 = vmatprep.subr.bf16.mxu0 %v2239_v28  ;;  %v1795_v15 = vmul.f32 %v1794_v29, %v2522_v35  ;;  %v1796_v34 = vmul.f32 %v1793_v46, %v2525_v36 }
 0x88d   : > { %v1798_v31 = vpop.permute.xlu1 %1797  ;;  %2242 = vmatpush1.bf16.msra.mxu0 %v2241_v51 }
 0x88e   : > { %v1800_v16 = vpop.permute.xlu0 %1799 }
 0x88f   : > { %v1801_v17 = vsel %vm675_vm3, %v1798_v31, %v1800_v16  ;;  %v1802_v14 = vsel %vm675_vm3, %v1800_v16, %v1798_v31 }
 0x890   : > { %v1803_v41 = vmul.f32 %v1802_v14, %v2529_v37  ;;  %v1804_v52 = vmul.f32 %v1801_v17, %v2532_v38  ;;  %v1806_v37 = vmul.f32 %v1771_v0, %v2544_v44 }
 0x891   : > { %v1808_v53 = vpop.permute.xlu1 %1807 }
 0x892   : > { %v2245_v54 = vpack.c.bf16 %v1803_v41, %v1795_v15  ;;  %v1810_v50 = vpop.permute.xlu0 %1809  ;;  %v2243_v55 = vpack.c.bf16 %v1804_v52, %v1796_v34 }
 0x893   : > { %v1811_v58 = vsel %vm712_vm4, %v1808_v53, %v1810_v50  ;;  %v1812_v59 = vsel %vm712_vm4, %v1810_v50, %v1808_v53 }
 0x894   : > { %v1813_v35 = vmul.f32 %v1811_v58, %v2554_v48  ;;  %v1814_v36 = vmul.f32 %v1812_v59, %v2557_v49  ;;  %2244 = vmatprep.subr.bf16.mxu0 %v2243_v55 }
 0x895   : > { %v1816_v38 = vpop.permute.xlu1 %1815  ;;  %2246 = vmatpush1.bf16.msra.mxu0 %v2245_v54 }
 0x896   : > { %v2249_v32 = vpack.c.bf16 %v1813_v35, %v1805_v60  ;;  %v1818_v33 = vpop.permute.xlu0 %1817  ;;  %v2247_v56 = vpack.c.bf16 %v1814_v36, %v1806_v37 }
 0x897   : > { %v1819_v57 = vsel %vm734_vm5, %v1816_v38, %v1818_v33  ;;  %v1820_v5 = vsel %vm734_vm5, %v1818_v33, %v1816_v38 }
 0x898   : > { %2248 = vmatprep.subr.bf16.mxu0 %v2247_v56  ;;  %v1821_v61 = vmul.f32 %v1819_v57, %v2591_v10  ;;  %v1822_v62 = vmul.f32 %v1820_v5, %v2594_v11  ;;  %v1772_v11 = vld [vmem:[%s3281_s15] sm:$0xff] }
 0x899   : > { %v1824_v45 = vpop.permute.xlu1 %1823  ;;  %2250 = vmatpush1.bf16.msra.mxu0 %v2249_v32 }
 0x89a   : > { %v1826_v48 = vpop.permute.xlu0 %1825 }
 0x89b   : > { %v1827_v49 = vsel %vm756_vm6, %v1824_v45, %v1826_v48  ;;  %v1828_v44 = vsel %vm756_vm6, %v1826_v48, %v1824_v45 }
 0x89c   : > { %v1829_v9 = vmul.f32 %v1827_v49, %v2599_v12  ;;  %v1830_v6 = vmul.f32 %v1828_v44, %v2602_v13 }
 0x89d   : > { %v1832_v63 = vpop.permute.xlu1 %1831 }
 0x89e   : > { %v2253_v3 = vpack.c.bf16 %v1829_v9, %v1821_v61  ;;  %v1834_v42 = vpop.permute.xlu0 %1833  ;;  %v2251_v39 = vpack.c.bf16 %v1830_v6, %v1822_v62 }
 0x89f   : > { %v1836_v0 = vsel %vm778_vm7, %v1834_v42, %v1832_v63  ;;  %v1835_v2 = vsel %vm778_vm7, %v1832_v63, %v1834_v42 }
 0x8a0   : > { %v1838_v8 = vmul.f32 %v1836_v0, %v2618_v25  ;;  %2252 = vmatprep.subr.bf16.mxu0 %v2251_v39  ;;  %v1837_v10 = vmul.f32 %v1835_v2, %v2625_v30 }
 0x8a1   : > { %2254 = vmatpush1.bf16.msra.mxu0 %v2253_v3 }
 0x8a2   : > { %1864 = vmatprep.subr.mxu0 %v1838_v8 }
 0x8a5   : > { %1865 = vmatpush1.msra.mxu0 %v1837_v10 }
 0x8a6   : > { %2090 = vmatmul.mubr.msk.f32.vlgmr.msra.gmra.mrb[4].mxu0 %vm802_vm8, %v1772_v11 }
 0x8ae   : > { %v1843_v12 = vpop.permute.xlu1 %1842 }
 0x8af   : > { %v1926_v30 = vpop.permute.xlu0 %1925 }
 0x979   : > { %v1914_v13 = vpop.f32.mrb[4].mxu0 }
 0x97a   : > { %v1915_v1 = vadd.f32 %v1914_v13, %v1843_v12  ;;  %v1916_v7 = vpop.f32.mrb[5].mxu0 }
 0x97b   : > { %v1917_v47 = vadd.f32 %v1916_v7, %v1843_v12 }
 0x97c   : > { %v1919_v25 = vmax.f32 %v1915_v1, 0.0 }
 0x97d   : > { %v1920_v4 = vmax.f32 %v1917_v47, 0.0 }
 0x97f   : > { %1931 = vmatprep.subr.mxu1 %v1920_v4 }
 0x980   : > { %1932 = vmatpush1.msra.mxu1 %v1919_v25 }
 0x981   : > { %2091 = vmatmul.mubr.msk.f32.vlgmr.msra.gmra.mrb[6].mxu1 %vm1191_vm10, %v1921_v18 }
 0xa54   : > { %v1997_v21 = vpop.f32.mrb[6].mxu1 }
 0xa55   : > { %v1998_v40 = vadd.f32 %v1997_v21, %v1926_v30  ;;  %v1999_v22 = vpop.f32.mrb[7].mxu1 }
 0xa56   : > { %v2000_v23 = vadd.f32 %v1999_v22, %v1926_v30 }
 0xa58   : > { %v2002_v19 = vmax.f32 %v1998_v40, %v2000_v23 }
 0xa5a   : > { %2003 = vmax.xlane.f32.xlu1 %v2002_v19 }
 0xae7   : > { %v2004_v20 = vpop.xlane.xlu1 %2003 }
 0xae8   : > { %2006 = vst.msk [vmem:[%s600_s29] sm:$0xff] %vm2005_vm0, %v2004_v20 }
 0xae9 PF: > { %s29_s0 = sadd.s32 1, %s2293_s0  }
 0xaea   : > { %p26_p4 = scmp.ge.s32.totalorder %s29_s0, 4  }
 0xaec   :  { %28 = sbr.rel (!%p26_p4) target bundleno = 5 (0x5), region = 142 }

</bundles_post_ra>
